<compile_context>
chip_gen: v6e
topology: v6e:2x2x1
jax: 0.10.0
libtpu: 0.0.40
codegen_flags: <defaults>
</compile_context>

<pallas_src>
import math

import jax
import jax.numpy as jnp
from jax.experimental import pallas as pl
from jax.experimental.pallas import tpu as pltpu

# -------------------- small synthetic BERT config --------------------
VOCAB = 100
MAX_POS = 16
TYPE_VOCAB = 2
SEQ = 8
HIDDEN = 32
NUM_HEADS = 4
HEAD_DIM = HIDDEN // NUM_HEADS
INTERMEDIATE = 64
NUM_LAYERS = 2
NUM_LABELS = 7
NUM_LABELS_PAD = 128          # lane-dense padded classifier width
LN_EPS = 1e-12
ATTN_SCALE = 1.0 / math.sqrt(float(HEAD_DIM))   # folded into Q weights/bias at init
GELU_C = math.sqrt(2.0 / math.pi)               # python float (not a traced constant)

# ---- packed-parameter layout ----
# Bias / LayerNorm vector slab: [VEC_ROWS, 128] f32, one vector per row (zero padded).
VEC_EMB_LN_G = 0
VEC_EMB_LN_B = 1
VEC_BP = 2
VEC_BC = 3
VEC_LAYER_BASE = 4            # per layer: bqkv, bo, ln1_g, ln1_b, bi, bo2, ln2_g, ln2_b
VEC_PER_LAYER = 8
VEC_ROWS = VEC_LAYER_BASE + NUM_LAYERS * VEC_PER_LAYER

# Per-layer weight slab: [NUM_LAYERS, WL_ROWS, WL_COLS] bf16, 128-lane-aligned blocks.
WL_ROWS = 64                  # max(HIDDEN, INTERMEDIATE)
WL_COLS = 512
WQKV_COL = 0                  # [0:HIDDEN,        0:3*HIDDEN]
WO_COL = 128                  # [0:HIDDEN,        128:128+HIDDEN]
WI_COL = 256                  # [0:HIDDEN,        256:256+INTERMEDIATE]
WO2_COL = 384                 # [0:INTERMEDIATE,  384:384+HIDDEN]

# Pooler / classifier slab: [HIDDEN, WH_COLS] bf16.
WH_COLS = 256
WP_COL = 0                    # [:, 0:HIDDEN]
WC_COL = 128                  # [:, 128:256]   (classifier, zero padded from 7 labels)

VMEM_SPEC = pl.BlockSpec(memory_space=pltpu.MemorySpace.VMEM)


# -------------------- fused Pallas kernel --------------------
def _bert_fused_kernel(
    emb_ref,        # [SEQ, HIDDEN]                f32
    vec_ref,        # [VEC_ROWS, 128]              f32   (all biases / LN params)
    wl_ref,         # [NUM_LAYERS, WL_ROWS, WL_COLS] bf16 (per-layer weight matrices)
    wh_ref,         # [HIDDEN, WH_COLS]            bf16  (pooler | classifier)
    logits_ref,     # out: [1, NUM_LABELS_PAD]     f32
):
    def layernorm(x, g, b):
        mean = jnp.mean(x, axis=-1, keepdims=True)
        cent = x - mean
        var = jnp.mean(cent * cent, axis=-1, keepdims=True)
        return cent * jax.lax.rsqrt(var + LN_EPS) * g + b

    def vrow(row, width):
        return vec_ref[row:row + 1, 0:width]        # [1, width] f32 (static slice)

    # Embedding LayerNorm (word/pos/type adds already folded in by the wrapper).
    x = layernorm(emb_ref[...], vrow(VEC_EMB_LN_G, HIDDEN), vrow(VEC_EMB_LN_B, HIDDEN))

    for l in range(NUM_LAYERS):
        base = VEC_LAYER_BASE + l * VEC_PER_LAYER
        wqkv = wl_ref[l, 0:HIDDEN, WQKV_COL:WQKV_COL + 3 * HIDDEN]        # bf16
        wo = wl_ref[l, 0:HIDDEN, WO_COL:WO_COL + HIDDEN]
        wi = wl_ref[l, 0:HIDDEN, WI_COL:WI_COL + INTERMEDIATE]
        wo2 = wl_ref[l, 0:INTERMEDIATE, WO2_COL:WO2_COL + HIDDEN]

        # Fused QKV projection (1/sqrt(head_dim) pre-folded into Q weight & bias).
        qkv = (jnp.dot(x.astype(jnp.bfloat16), wqkv,
                       preferred_element_type=jnp.float32)
               + vrow(base + 0, 3 * HIDDEN))                               # [S, 3H]

        # Batched per-head attention: one dot_general pair for all heads.
        def split_heads(t):                         # [SEQ, HIDDEN] -> [H, SEQ, Dh]
            return jnp.stack(
                [t[:, h * HEAD_DIM:(h + 1) * HEAD_DIM] for h in range(NUM_HEADS)],
                axis=0)

        qh = split_heads(qkv[:, 0:HIDDEN]).astype(jnp.bfloat16)
        kh = split_heads(qkv[:, HIDDEN:2 * HIDDEN]).astype(jnp.bfloat16)
        vh = split_heads(qkv[:, 2 * HIDDEN:3 * HIDDEN]).astype(jnp.bfloat16)

        s = jax.lax.dot_general(qh, kh, (((2,), (2,)), ((0,), (0,))),
                                preferred_element_type=jnp.float32)       # [H, S, S]
        s = s - jnp.max(s, axis=-1, keepdims=True)
        p = jnp.exp(s)
        p = p * pl.reciprocal(jnp.sum(p, axis=-1, keepdims=True), approx=True)
        ctx_h = jax.lax.dot_general(p.astype(jnp.bfloat16), vh,
                                    (((2,), (1,)), ((0,), (0,))),
                                    preferred_element_type=jnp.float32)   # [H, S, Dh]
        ctx = jnp.concatenate([ctx_h[h] for h in range(NUM_HEADS)], axis=-1)  # [S, H*Dh]

        # Attention output projection + residual + LN1.
        attn_out = (jnp.dot(ctx.astype(jnp.bfloat16), wo,
                            preferred_element_type=jnp.float32)
                    + vrow(base + 1, HIDDEN))
        x = layernorm(attn_out + x, vrow(base + 2, HIDDEN), vrow(base + 3, HIDDEN))

        # FFN with GELU, residual + LN2.
        inter = (jnp.dot(x.astype(jnp.bfloat16), wi,
                         preferred_element_type=jnp.float32)
                 + vrow(base + 4, INTERMEDIATE))
        # TODO(synk): HF BERT uses exact erf-GELU; tanh approximation used here.
        inter = 0.5 * inter * (
            1.0 + jnp.tanh(GELU_C * (inter + 0.044715 * inter * inter * inter)))
        ffn = (jnp.dot(inter.astype(jnp.bfloat16), wo2,
                       preferred_element_type=jnp.float32)
               + vrow(base + 5, HIDDEN))
        x = layernorm(ffn + x, vrow(base + 6, HIDDEN), vrow(base + 7, HIDDEN))

    # Pooler (tanh on [CLS]) + classifier head (dropout is identity in eval).
    wp = wh_ref[:, WP_COL:WP_COL + HIDDEN]
    wc = wh_ref[:, WC_COL:WC_COL + NUM_LABELS_PAD]
    pooled = jnp.tanh(
        jnp.dot(x[0:1, :].astype(jnp.bfloat16), wp,
                preferred_element_type=jnp.float32) + vrow(VEC_BP, HIDDEN))
    logits_ref[...] = (
        jnp.dot(pooled.astype(jnp.bfloat16), wc,
                preferred_element_type=jnp.float32) + vrow(VEC_BC, NUM_LABELS_PAD))


def bert_forward_fused(emb, params):
    return pl.pallas_call(
        _bert_fused_kernel,
        out_shape=jax.ShapeDtypeStruct((1, NUM_LABELS_PAD), jnp.float32),
        in_specs=[VMEM_SPEC] * 4,
        out_specs=VMEM_SPEC,
    )(emb, params["vec"], params["wl"], params["wh"])


# -------------------- deterministic parameter init (packed slabs) --------------------
def init_params(key):
    keys = iter(jax.random.split(key, 32))

    def nrm(shape):
        return (0.02 * jax.random.normal(next(keys), shape)).astype(jnp.float32)

    word_emb = nrm((VOCAB, HIDDEN))
    pos_emb = nrm((MAX_POS, HIDDEN))
    type_emb = nrm((TYPE_VOCAB, HIDDEN))

    vec = jnp.zeros((VEC_ROWS, 128), jnp.float32)

    def put(slab, row, val):
        return slab.at[row, :val.shape[0]].set(val)

    vec = put(vec, VEC_EMB_LN_G, jnp.ones((HIDDEN,), jnp.float32))
    vec = put(vec, VEC_EMB_LN_B, jnp.zeros((HIDDEN,), jnp.float32))
    vec = put(vec, VEC_BP, nrm((HIDDEN,)))
    vec = put(vec, VEC_BC, nrm((NUM_LABELS,)))      # padded to 128 lanes with zeros

    wl = jnp.zeros((NUM_LAYERS, WL_ROWS, WL_COLS), jnp.float32)
    for l in range(NUM_LAYERS):
        wqkv = nrm((HIDDEN, 3 * HIDDEN))            # fused Q|K|V
        bqkv = nrm((3 * HIDDEN,))
        # Fold 1/sqrt(head_dim) into the Q columns (weight + bias) once, at init.
        wqkv = wqkv.at[:, 0:HIDDEN].multiply(ATTN_SCALE)
        bqkv = bqkv.at[0:HIDDEN].multiply(ATTN_SCALE)
        wo = nrm((HIDDEN, HIDDEN))
        bo = nrm((HIDDEN,))
        wi = nrm((HIDDEN, INTERMEDIATE))
        bi = nrm((INTERMEDIATE,))
        wo2 = nrm((INTERMEDIATE, HIDDEN))
        bo2 = nrm((HIDDEN,))

        wl = wl.at[l, 0:HIDDEN, WQKV_COL:WQKV_COL + 3 * HIDDEN].set(wqkv)
        wl = wl.at[l, 0:HIDDEN, WO_COL:WO_COL + HIDDEN].set(wo)
        wl = wl.at[l, 0:HIDDEN, WI_COL:WI_COL + INTERMEDIATE].set(wi)
        wl = wl.at[l, 0:INTERMEDIATE, WO2_COL:WO2_COL + HIDDEN].set(wo2)

        base = VEC_LAYER_BASE + l * VEC_PER_LAYER
        vec = put(vec, base + 0, bqkv)
        vec = put(vec, base + 1, bo)
        vec = put(vec, base + 2, jnp.ones((HIDDEN,), jnp.float32))   # ln1_g
        vec = put(vec, base + 3, jnp.zeros((HIDDEN,), jnp.float32))  # ln1_b
        vec = put(vec, base + 4, bi)
        vec = put(vec, base + 5, bo2)
        vec = put(vec, base + 6, jnp.ones((HIDDEN,), jnp.float32))   # ln2_g
        vec = put(vec, base + 7, jnp.zeros((HIDDEN,), jnp.float32))  # ln2_b

    wh = jnp.zeros((HIDDEN, WH_COLS), jnp.float32)
    wh = wh.at[:, WP_COL:WP_COL + HIDDEN].set(nrm((HIDDEN, HIDDEN)))          # pooler
    wh = wh.at[:, WC_COL:WC_COL + NUM_LABELS].set(nrm((HIDDEN, NUM_LABELS)))  # classifier

    return {
        "word_emb": word_emb,
        "pos_emb": pos_emb,
        "type_emb": type_emb,
        "vec": vec,                               # f32  [20, 128]
        "wl": wl.astype(jnp.bfloat16),            # bf16 [2, 64, 512]
        "wh": wh.astype(jnp.bfloat16),            # bf16 [32, 256]
    }


# -------------------- forward pass (MyModel.forward equivalent) --------------------
def my_model_forward(params, input_ids, label):
    # input_ids: [1, SEQ] int32 (batch of 1, as in the PyTorch module)
    ids = input_ids[0]
    s = ids.shape[0]

    # Embedding lookup (gather) kept in JAX glue; token_type_ids = 0; no padding mask
    # (full-length sequence, matching the reference call with input_ids only).
    emb = (
        jnp.take(params["word_emb"], ids, axis=0)
        + params["pos_emb"][:s]
        + params["type_emb"][0][None, :]
    )

    # Everything else (emb LN, both encoder layers, pooler, classifier) in one kernel.
    logits_pad = bert_forward_fused(emb, params)            # [1, NUM_LABELS_PAD]
    logits = logits_pad[0, :NUM_LABELS]

    # Cross-entropy loss & argmax over 7 logits: negligible, done in JAX glue.
    log_probs = jax.nn.log_softmax(logits)
    loss = -log_probs[label]
    pre_label = jnp.argmax(logits)
    return pre_label, loss


if __name__ == "__main__":
    key = jax.random.PRNGKey(0)
    pkey, ikey = jax.random.split(key)
    params = init_params(pkey)

    input_ids = jax.random.randint(ikey, (1, SEQ), 0, VOCAB, dtype=jnp.int32)
    label = jnp.int32(3)

    pre_label, loss = jax.jit(my_model_forward)(params, input_ids, label)
    jax.block_until_ready((pre_label, loss))
    pre_label = int(pre_label)  # mirrors `int(torch.argmax(output))`
    print("KERNEL_OK")
</pallas_src>

<mosaic_0001>
module attributes {stable_mosaic.version = 11 : i64} {
  func.func @_bert_fused_kernel(%arg0: memref<8x32xf32, #tpu.memory_space<vmem>>, %arg1: memref<20x128xf32, #tpu.memory_space<vmem>>, %arg2: memref<2x64x512xbf16, #tpu.memory_space<vmem>>, %arg3: memref<32x256xbf16, #tpu.memory_space<vmem>>, %arg4: memref<1x128xf32, #tpu.memory_space<vmem>>) attributes {dimension_semantics = [], scalar_prefetch = 0 : i64, scratch_operands = 0 : i64, tpu.core_type = #tpu.core_type<tc>} {
    %c0 = arith.constant 0 : index
    %c0_0 = arith.constant 0 : index
    %0 = vector.load %arg0[%c0, %c0_0] : memref<8x32xf32, #tpu.memory_space<vmem>>, vector<8x32xf32>
    %c0_1 = arith.constant 0 : index
    %c0_2 = arith.constant 0 : index
    %1 = vector.load %arg1[%c0_1, %c0_2] : memref<20x128xf32, #tpu.memory_space<vmem>>, vector<1x32xf32>
    %c1 = arith.constant 1 : index
    %c0_3 = arith.constant 0 : index
    %2 = vector.load %arg1[%c1, %c0_3] : memref<20x128xf32, #tpu.memory_space<vmem>>, vector<1x32xf32>
    %cst = arith.constant dense<0.000000e+00> : vector<8xf32>
    %3 = vector.multi_reduction <add>, %0, %cst [1] : vector<8x32xf32> to vector<8xf32>
    %4 = vector.shape_cast %3 : vector<8xf32> to vector<8x1xf32>
    %cst_4 = arith.constant 3.200000e+01 : f32
    %5 = vector.broadcast %cst_4 : f32 to vector<8x1xf32>
    %6 = arith.divf %4, %5 : vector<8x1xf32>
    %7 = vector.broadcast %6 : vector<8x1xf32> to vector<8x32xf32>
    %8 = arith.subf %0, %7 : vector<8x32xf32>
    %9 = arith.mulf %8, %8 : vector<8x32xf32>
    %cst_5 = arith.constant dense<0.000000e+00> : vector<8xf32>
    %10 = vector.multi_reduction <add>, %9, %cst_5 [1] : vector<8x32xf32> to vector<8xf32>
    %11 = vector.shape_cast %10 : vector<8xf32> to vector<8x1xf32>
    %cst_6 = arith.constant 3.200000e+01 : f32
    %12 = vector.broadcast %cst_6 : f32 to vector<8x1xf32>
    %13 = arith.divf %11, %12 : vector<8x1xf32>
    %cst_7 = arith.constant 9.99999996E-13 : f32
    %14 = vector.broadcast %cst_7 : f32 to vector<8x1xf32>
    %15 = arith.addf %13, %14 : vector<8x1xf32>
    %16 = math.rsqrt %15 : vector<8x1xf32>
    %17 = vector.broadcast %16 : vector<8x1xf32> to vector<8x32xf32>
    %18 = arith.mulf %8, %17 : vector<8x32xf32>
    %19 = vector.broadcast %1 : vector<1x32xf32> to vector<8x32xf32>
    %20 = arith.mulf %18, %19 : vector<8x32xf32>
    %21 = vector.broadcast %2 : vector<1x32xf32> to vector<8x32xf32>
    %22 = arith.addf %20, %21 : vector<8x32xf32>
    %c0_8 = arith.constant 0 : index
    %c0_9 = arith.constant 0 : index
    %c0_10 = arith.constant 0 : index
    %23 = vector.load %arg2[%c0_8, %c0_9, %c0_10] : memref<2x64x512xbf16, #tpu.memory_space<vmem>>, vector<1x32x96xbf16>
    %24 = vector.shape_cast %23 : vector<1x32x96xbf16> to vector<32x96xbf16>
    %c0_11 = arith.constant 0 : index
    %c0_12 = arith.constant 0 : index
    %c128 = arith.constant 128 : index
    %25 = vector.load %arg2[%c0_11, %c0_12, %c128] : memref<2x64x512xbf16, #tpu.memory_space<vmem>>, vector<1x32x32xbf16>
    %26 = vector.shape_cast %25 : vector<1x32x32xbf16> to vector<32x32xbf16>
    %c0_13 = arith.constant 0 : index
    %c0_14 = arith.constant 0 : index
    %c256 = arith.constant 256 : index
    %27 = vector.load %arg2[%c0_13, %c0_14, %c256] : memref<2x64x512xbf16, #tpu.memory_space<vmem>>, vector<1x32x64xbf16>
    %28 = vector.shape_cast %27 : vector<1x32x64xbf16> to vector<32x64xbf16>
    %c0_15 = arith.constant 0 : index
    %c0_16 = arith.constant 0 : index
    %c384 = arith.constant 384 : index
    %29 = vector.load %arg2[%c0_15, %c0_16, %c384] : memref<2x64x512xbf16, #tpu.memory_space<vmem>>, vector<1x64x32xbf16>
    %30 = vector.shape_cast %29 : vector<1x64x32xbf16> to vector<64x32xbf16>
    %31 = arith.truncf %22 : vector<8x32xf32> to vector<8x32xbf16>
    %cst_17 = arith.constant dense<0.000000e+00> : vector<8x96xf32>
    %32 = tpu.matmul %31, %24, %cst_17 {dimension_numbers = #tpu.dot_dimension_numbers<[1], [0], [0], [1], [0, 0, 1, 1], [], []>} : vector<8x32xbf16>, vector<32x96xbf16>, vector<8x96xf32> -> vector<8x96xf32>
    %c4 = arith.constant 4 : index
    %c0_18 = arith.constant 0 : index
    %33 = vector.load %arg1[%c4, %c0_18] : memref<20x128xf32, #tpu.memory_space<vmem>>, vector<1x96xf32>
    %34 = vector.broadcast %33 : vector<1x96xf32> to vector<8x96xf32>
    %35 = arith.addf %32, %34 : vector<8x96xf32>
    %36 = vector.extract_strided_slice %35 {offsets = [0, 0], sizes = [8, 32], strides = [1, 1]} : vector<8x96xf32> to vector<8x32xf32>
    %37 = vector.extract_strided_slice %36 {offsets = [0, 0], sizes = [8, 8], strides = [1, 1]} : vector<8x32xf32> to vector<8x8xf32>
    %38 = vector.extract_strided_slice %36 {offsets = [0, 8], sizes = [8, 8], strides = [1, 1]} : vector<8x32xf32> to vector<8x8xf32>
    %39 = vector.extract_strided_slice %36 {offsets = [0, 16], sizes = [8, 8], strides = [1, 1]} : vector<8x32xf32> to vector<8x8xf32>
    %40 = vector.extract_strided_slice %36 {offsets = [0, 24], sizes = [8, 8], strides = [1, 1]} : vector<8x32xf32> to vector<8x8xf32>
    %41 = vector.shape_cast %37 : vector<8x8xf32> to vector<1x8x8xf32>
    %42 = vector.shape_cast %38 : vector<8x8xf32> to vector<1x8x8xf32>
    %43 = vector.shape_cast %39 : vector<8x8xf32> to vector<1x8x8xf32>
    %44 = vector.shape_cast %40 : vector<8x8xf32> to vector<1x8x8xf32>
    %45 = tpu.concatenate %41, %42, %43, %44 in 0 : vector<1x8x8xf32>, vector<1x8x8xf32>, vector<1x8x8xf32>, vector<1x8x8xf32> -> vector<4x8x8xf32>
    %46 = arith.truncf %45 : vector<4x8x8xf32> to vector<4x8x8xbf16>
    %47 = vector.extract_strided_slice %35 {offsets = [0, 32], sizes = [8, 32], strides = [1, 1]} : vector<8x96xf32> to vector<8x32xf32>
    %48 = vector.extract_strided_slice %47 {offsets = [0, 0], sizes = [8, 8], strides = [1, 1]} : vector<8x32xf32> to vector<8x8xf32>
    %49 = vector.extract_strided_slice %47 {offsets = [0, 8], sizes = [8, 8], strides = [1, 1]} : vector<8x32xf32> to vector<8x8xf32>
    %50 = vector.extract_strided_slice %47 {offsets = [0, 16], sizes = [8, 8], strides = [1, 1]} : vector<8x32xf32> to vector<8x8xf32>
    %51 = vector.extract_strided_slice %47 {offsets = [0, 24], sizes = [8, 8], strides = [1, 1]} : vector<8x32xf32> to vector<8x8xf32>
    %52 = vector.shape_cast %48 : vector<8x8xf32> to vector<1x8x8xf32>
    %53 = vector.shape_cast %49 : vector<8x8xf32> to vector<1x8x8xf32>
    %54 = vector.shape_cast %50 : vector<8x8xf32> to vector<1x8x8xf32>
    %55 = vector.shape_cast %51 : vector<8x8xf32> to vector<1x8x8xf32>
    %56 = tpu.concatenate %52, %53, %54, %55 in 0 : vector<1x8x8xf32>, vector<1x8x8xf32>, vector<1x8x8xf32>, vector<1x8x8xf32> -> vector<4x8x8xf32>
    %57 = arith.truncf %56 : vector<4x8x8xf32> to vector<4x8x8xbf16>
    %58 = vector.extract_strided_slice %35 {offsets = [0, 64], sizes = [8, 32], strides = [1, 1]} : vector<8x96xf32> to vector<8x32xf32>
    %59 = vector.extract_strided_slice %58 {offsets = [0, 0], sizes = [8, 8], strides = [1, 1]} : vector<8x32xf32> to vector<8x8xf32>
    %60 = vector.extract_strided_slice %58 {offsets = [0, 8], sizes = [8, 8], strides = [1, 1]} : vector<8x32xf32> to vector<8x8xf32>
    %61 = vector.extract_strided_slice %58 {offsets = [0, 16], sizes = [8, 8], strides = [1, 1]} : vector<8x32xf32> to vector<8x8xf32>
    %62 = vector.extract_strided_slice %58 {offsets = [0, 24], sizes = [8, 8], strides = [1, 1]} : vector<8x32xf32> to vector<8x8xf32>
    %63 = vector.shape_cast %59 : vector<8x8xf32> to vector<1x8x8xf32>
    %64 = vector.shape_cast %60 : vector<8x8xf32> to vector<1x8x8xf32>
    %65 = vector.shape_cast %61 : vector<8x8xf32> to vector<1x8x8xf32>
    %66 = vector.shape_cast %62 : vector<8x8xf32> to vector<1x8x8xf32>
    %67 = tpu.concatenate %63, %64, %65, %66 in 0 : vector<1x8x8xf32>, vector<1x8x8xf32>, vector<1x8x8xf32>, vector<1x8x8xf32> -> vector<4x8x8xf32>
    %68 = arith.truncf %67 : vector<4x8x8xf32> to vector<4x8x8xbf16>
    %cst_19 = arith.constant dense<0.000000e+00> : vector<4x8x8xf32>
    %69 = tpu.matmul %46, %57, %cst_19 {dimension_numbers = #tpu.dot_dimension_numbers<[2], [2], [1], [1], [0, 0, 0, 1, 1, 1], [0], [0]>} : vector<4x8x8xbf16>, vector<4x8x8xbf16>, vector<4x8x8xf32> -> vector<4x8x8xf32>
    %cst_20 = arith.constant dense<0xFF800000> : vector<4x8xf32>
    %70 = vector.multi_reduction <maximumf>, %69, %cst_20 [2] : vector<4x8x8xf32> to vector<4x8xf32>
    %71 = vector.shape_cast %70 : vector<4x8xf32> to vector<4x8x1xf32>
    %72 = vector.broadcast %71 : vector<4x8x1xf32> to vector<4x8x8xf32>
    %73 = arith.subf %69, %72 : vector<4x8x8xf32>
    %74 = math.exp %73 : vector<4x8x8xf32>
    %cst_21 = arith.constant dense<0.000000e+00> : vector<4x8xf32>
    %75 = vector.multi_reduction <add>, %74, %cst_21 [2] : vector<4x8x8xf32> to vector<4x8xf32>
    %76 = vector.shape_cast %75 : vector<4x8xf32> to vector<4x8x1xf32>
    %77 = tpu.reciprocal %76 {approx = true} : vector<4x8x1xf32> -> vector<4x8x1xf32>
    %78 = vector.broadcast %77 : vector<4x8x1xf32> to vector<4x8x8xf32>
    %79 = arith.mulf %74, %78 : vector<4x8x8xf32>
    %80 = arith.truncf %79 : vector<4x8x8xf32> to vector<4x8x8xbf16>
    %cst_22 = arith.constant dense<0.000000e+00> : vector<4x8x8xf32>
    %81 = tpu.matmul %80, %68, %cst_22 {dimension_numbers = #tpu.dot_dimension_numbers<[2], [1], [1], [2], [0, 0, 0, 1, 1, 2], [0], [0]>} : vector<4x8x8xbf16>, vector<4x8x8xbf16>, vector<4x8x8xf32> -> vector<4x8x8xf32>
    %82 = vector.extract_strided_slice %81 {offsets = [0, 0, 0], sizes = [1, 8, 8], strides = [1, 1, 1]} : vector<4x8x8xf32> to vector<1x8x8xf32>
    %83 = vector.shape_cast %82 : vector<1x8x8xf32> to vector<8x8xf32>
    %84 = vector.extract_strided_slice %81 {offsets = [1, 0, 0], sizes = [1, 8, 8], strides = [1, 1, 1]} : vector<4x8x8xf32> to vector<1x8x8xf32>
    %85 = vector.shape_cast %84 : vector<1x8x8xf32> to vector<8x8xf32>
    %86 = vector.extract_strided_slice %81 {offsets = [2, 0, 0], sizes = [1, 8, 8], strides = [1, 1, 1]} : vector<4x8x8xf32> to vector<1x8x8xf32>
    %87 = vector.shape_cast %86 : vector<1x8x8xf32> to vector<8x8xf32>
    %88 = vector.extract_strided_slice %81 {offsets = [3, 0, 0], sizes = [1, 8, 8], strides = [1, 1, 1]} : vector<4x8x8xf32> to vector<1x8x8xf32>
    %89 = vector.shape_cast %88 : vector<1x8x8xf32> to vector<8x8xf32>
    %90 = tpu.concatenate %83, %85, %87, %89 in 1 : vector<8x8xf32>, vector<8x8xf32>, vector<8x8xf32>, vector<8x8xf32> -> vector<8x32xf32>
    %91 = arith.truncf %90 : vector<8x32xf32> to vector<8x32xbf16>
    %cst_23 = arith.constant dense<0.000000e+00> : vector<8x32xf32>
    %92 = tpu.matmul %91, %26, %cst_23 {dimension_numbers = #tpu.dot_dimension_numbers<[1], [0], [0], [1], [0, 0, 1, 1], [], []>} : vector<8x32xbf16>, vector<32x32xbf16>, vector<8x32xf32> -> vector<8x32xf32>
    %c5 = arith.constant 5 : index
    %c0_24 = arith.constant 0 : index
    %93 = vector.load %arg1[%c5, %c0_24] : memref<20x128xf32, #tpu.memory_space<vmem>>, vector<1x32xf32>
    %94 = vector.broadcast %93 : vector<1x32xf32> to vector<8x32xf32>
    %95 = arith.addf %92, %94 : vector<8x32xf32>
    %96 = arith.addf %95, %22 : vector<8x32xf32>
    %c6 = arith.constant 6 : index
    %c0_25 = arith.constant 0 : index
    %97 = vector.load %arg1[%c6, %c0_25] : memref<20x128xf32, #tpu.memory_space<vmem>>, vector<1x32xf32>
    %c7 = arith.constant 7 : index
    %c0_26 = arith.constant 0 : index
    %98 = vector.load %arg1[%c7, %c0_26] : memref<20x128xf32, #tpu.memory_space<vmem>>, vector<1x32xf32>
    %cst_27 = arith.constant dense<0.000000e+00> : vector<8xf32>
    %99 = vector.multi_reduction <add>, %96, %cst_27 [1] : vector<8x32xf32> to vector<8xf32>
    %100 = vector.shape_cast %99 : vector<8xf32> to vector<8x1xf32>
    %cst_28 = arith.constant 3.200000e+01 : f32
    %101 = vector.broadcast %cst_28 : f32 to vector<8x1xf32>
    %102 = arith.divf %100, %101 : vector<8x1xf32>
    %103 = vector.broadcast %102 : vector<8x1xf32> to vector<8x32xf32>
    %104 = arith.subf %96, %103 : vector<8x32xf32>
    %105 = arith.mulf %104, %104 : vector<8x32xf32>
    %cst_29 = arith.constant dense<0.000000e+00> : vector<8xf32>
    %106 = vector.multi_reduction <add>, %105, %cst_29 [1] : vector<8x32xf32> to vector<8xf32>
    %107 = vector.shape_cast %106 : vector<8xf32> to vector<8x1xf32>
    %cst_30 = arith.constant 3.200000e+01 : f32
    %108 = vector.broadcast %cst_30 : f32 to vector<8x1xf32>
    %109 = arith.divf %107, %108 : vector<8x1xf32>
    %cst_31 = arith.constant 9.99999996E-13 : f32
    %110 = vector.broadcast %cst_31 : f32 to vector<8x1xf32>
    %111 = arith.addf %109, %110 : vector<8x1xf32>
    %112 = math.rsqrt %111 : vector<8x1xf32>
    %113 = vector.broadcast %112 : vector<8x1xf32> to vector<8x32xf32>
    %114 = arith.mulf %104, %113 : vector<8x32xf32>
    %115 = vector.broadcast %97 : vector<1x32xf32> to vector<8x32xf32>
    %116 = arith.mulf %114, %115 : vector<8x32xf32>
    %117 = vector.broadcast %98 : vector<1x32xf32> to vector<8x32xf32>
    %118 = arith.addf %116, %117 : vector<8x32xf32>
    %119 = arith.truncf %118 : vector<8x32xf32> to vector<8x32xbf16>
    %cst_32 = arith.constant dense<0.000000e+00> : vector<8x64xf32>
    %120 = tpu.matmul %119, %28, %cst_32 {dimension_numbers = #tpu.dot_dimension_numbers<[1], [0], [0], [1], [0, 0, 1, 1], [], []>} : vector<8x32xbf16>, vector<32x64xbf16>, vector<8x64xf32> -> vector<8x64xf32>
    %c8 = arith.constant 8 : index
    %c0_33 = arith.constant 0 : index
    %121 = vector.load %arg1[%c8, %c0_33] : memref<20x128xf32, #tpu.memory_space<vmem>>, vector<1x64xf32>
    %122 = vector.broadcast %121 : vector<1x64xf32> to vector<8x64xf32>
    %123 = arith.addf %120, %122 : vector<8x64xf32>
    %cst_34 = arith.constant 5.000000e-01 : f32
    %124 = vector.broadcast %cst_34 : f32 to vector<8x64xf32>
    %125 = arith.mulf %124, %123 : vector<8x64xf32>
    %cst_35 = arith.constant 4.471500e-02 : f32
    %126 = vector.broadcast %cst_35 : f32 to vector<8x64xf32>
    %127 = arith.mulf %126, %123 : vector<8x64xf32>
    %128 = arith.mulf %127, %123 : vector<8x64xf32>
    %129 = arith.mulf %128, %123 : vector<8x64xf32>
    %130 = arith.addf %123, %129 : vector<8x64xf32>
    %cst_36 = arith.constant 0.797884583 : f32
    %131 = vector.broadcast %cst_36 : f32 to vector<8x64xf32>
    %132 = arith.mulf %131, %130 : vector<8x64xf32>
    %133 = math.tanh %132 : vector<8x64xf32>
    %cst_37 = arith.constant 1.000000e+00 : f32
    %134 = vector.broadcast %cst_37 : f32 to vector<8x64xf32>
    %135 = arith.addf %134, %133 : vector<8x64xf32>
    %136 = arith.mulf %125, %135 : vector<8x64xf32>
    %137 = arith.truncf %136 : vector<8x64xf32> to vector<8x64xbf16>
    %cst_38 = arith.constant dense<0.000000e+00> : vector<8x32xf32>
    %138 = tpu.matmul %137, %30, %cst_38 {dimension_numbers = #tpu.dot_dimension_numbers<[1], [0], [0], [1], [0, 0, 1, 1], [], []>} : vector<8x64xbf16>, vector<64x32xbf16>, vector<8x32xf32> -> vector<8x32xf32>
    %c9 = arith.constant 9 : index
    %c0_39 = arith.constant 0 : index
    %139 = vector.load %arg1[%c9, %c0_39] : memref<20x128xf32, #tpu.memory_space<vmem>>, vector<1x32xf32>
    %140 = vector.broadcast %139 : vector<1x32xf32> to vector<8x32xf32>
    %141 = arith.addf %138, %140 : vector<8x32xf32>
    %142 = arith.addf %141, %118 : vector<8x32xf32>
    %c10 = arith.constant 10 : index
    %c0_40 = arith.constant 0 : index
    %143 = vector.load %arg1[%c10, %c0_40] : memref<20x128xf32, #tpu.memory_space<vmem>>, vector<1x32xf32>
    %c11 = arith.constant 11 : index
    %c0_41 = arith.constant 0 : index
    %144 = vector.load %arg1[%c11, %c0_41] : memref<20x128xf32, #tpu.memory_space<vmem>>, vector<1x32xf32>
    %cst_42 = arith.constant dense<0.000000e+00> : vector<8xf32>
    %145 = vector.multi_reduction <add>, %142, %cst_42 [1] : vector<8x32xf32> to vector<8xf32>
    %146 = vector.shape_cast %145 : vector<8xf32> to vector<8x1xf32>
    %cst_43 = arith.constant 3.200000e+01 : f32
    %147 = vector.broadcast %cst_43 : f32 to vector<8x1xf32>
    %148 = arith.divf %146, %147 : vector<8x1xf32>
    %149 = vector.broadcast %148 : vector<8x1xf32> to vector<8x32xf32>
    %150 = arith.subf %142, %149 : vector<8x32xf32>
    %151 = arith.mulf %150, %150 : vector<8x32xf32>
    %cst_44 = arith.constant dense<0.000000e+00> : vector<8xf32>
    %152 = vector.multi_reduction <add>, %151, %cst_44 [1] : vector<8x32xf32> to vector<8xf32>
    %153 = vector.shape_cast %152 : vector<8xf32> to vector<8x1xf32>
    %cst_45 = arith.constant 3.200000e+01 : f32
    %154 = vector.broadcast %cst_45 : f32 to vector<8x1xf32>
    %155 = arith.divf %153, %154 : vector<8x1xf32>
    %cst_46 = arith.constant 9.99999996E-13 : f32
    %156 = vector.broadcast %cst_46 : f32 to vector<8x1xf32>
    %157 = arith.addf %155, %156 : vector<8x1xf32>
    %158 = math.rsqrt %157 : vector<8x1xf32>
    %159 = vector.broadcast %158 : vector<8x1xf32> to vector<8x32xf32>
    %160 = arith.mulf %150, %159 : vector<8x32xf32>
    %161 = vector.broadcast %143 : vector<1x32xf32> to vector<8x32xf32>
    %162 = arith.mulf %160, %161 : vector<8x32xf32>
    %163 = vector.broadcast %144 : vector<1x32xf32> to vector<8x32xf32>
    %164 = arith.addf %162, %163 : vector<8x32xf32>
    %c1_47 = arith.constant 1 : index
    %c0_48 = arith.constant 0 : index
    %c0_49 = arith.constant 0 : index
    %165 = vector.load %arg2[%c1_47, %c0_48, %c0_49] : memref<2x64x512xbf16, #tpu.memory_space<vmem>>, vector<1x32x96xbf16>
    %166 = vector.shape_cast %165 : vector<1x32x96xbf16> to vector<32x96xbf16>
    %c1_50 = arith.constant 1 : index
    %c0_51 = arith.constant 0 : index
    %c128_52 = arith.constant 128 : index
    %167 = vector.load %arg2[%c1_50, %c0_51, %c128_52] : memref<2x64x512xbf16, #tpu.memory_space<vmem>>, vector<1x32x32xbf16>
    %168 = vector.shape_cast %167 : vector<1x32x32xbf16> to vector<32x32xbf16>
    %c1_53 = arith.constant 1 : index
    %c0_54 = arith.constant 0 : index
    %c256_55 = arith.constant 256 : index
    %169 = vector.load %arg2[%c1_53, %c0_54, %c256_55] : memref<2x64x512xbf16, #tpu.memory_space<vmem>>, vector<1x32x64xbf16>
    %170 = vector.shape_cast %169 : vector<1x32x64xbf16> to vector<32x64xbf16>
    %c1_56 = arith.constant 1 : index
    %c0_57 = arith.constant 0 : index
    %c384_58 = arith.constant 384 : index
    %171 = vector.load %arg2[%c1_56, %c0_57, %c384_58] : memref<2x64x512xbf16, #tpu.memory_space<vmem>>, vector<1x64x32xbf16>
    %172 = vector.shape_cast %171 : vector<1x64x32xbf16> to vector<64x32xbf16>
    %173 = arith.truncf %164 : vector<8x32xf32> to vector<8x32xbf16>
    %cst_59 = arith.constant dense<0.000000e+00> : vector<8x96xf32>
    %174 = tpu.matmul %173, %166, %cst_59 {dimension_numbers = #tpu.dot_dimension_numbers<[1], [0], [0], [1], [0, 0, 1, 1], [], []>} : vector<8x32xbf16>, vector<32x96xbf16>, vector<8x96xf32> -> vector<8x96xf32>
    %c12 = arith.constant 12 : index
    %c0_60 = arith.constant 0 : index
    %175 = vector.load %arg1[%c12, %c0_60] : memref<20x128xf32, #tpu.memory_space<vmem>>, vector<1x96xf32>
    %176 = vector.broadcast %175 : vector<1x96xf32> to vector<8x96xf32>
    %177 = arith.addf %174, %176 : vector<8x96xf32>
    %178 = vector.extract_strided_slice %177 {offsets = [0, 0], sizes = [8, 32], strides = [1, 1]} : vector<8x96xf32> to vector<8x32xf32>
    %179 = vector.extract_strided_slice %178 {offsets = [0, 0], sizes = [8, 8], strides = [1, 1]} : vector<8x32xf32> to vector<8x8xf32>
    %180 = vector.extract_strided_slice %178 {offsets = [0, 8], sizes = [8, 8], strides = [1, 1]} : vector<8x32xf32> to vector<8x8xf32>
    %181 = vector.extract_strided_slice %178 {offsets = [0, 16], sizes = [8, 8], strides = [1, 1]} : vector<8x32xf32> to vector<8x8xf32>
    %182 = vector.extract_strided_slice %178 {offsets = [0, 24], sizes = [8, 8], strides = [1, 1]} : vector<8x32xf32> to vector<8x8xf32>
    %183 = vector.shape_cast %179 : vector<8x8xf32> to vector<1x8x8xf32>
    %184 = vector.shape_cast %180 : vector<8x8xf32> to vector<1x8x8xf32>
    %185 = vector.shape_cast %181 : vector<8x8xf32> to vector<1x8x8xf32>
    %186 = vector.shape_cast %182 : vector<8x8xf32> to vector<1x8x8xf32>
    %187 = tpu.concatenate %183, %184, %185, %186 in 0 : vector<1x8x8xf32>, vector<1x8x8xf32>, vector<1x8x8xf32>, vector<1x8x8xf32> -> vector<4x8x8xf32>
    %188 = arith.truncf %187 : vector<4x8x8xf32> to vector<4x8x8xbf16>
    %189 = vector.extract_strided_slice %177 {offsets = [0, 32], sizes = [8, 32], strides = [1, 1]} : vector<8x96xf32> to vector<8x32xf32>
    %190 = vector.extract_strided_slice %189 {offsets = [0, 0], sizes = [8, 8], strides = [1, 1]} : vector<8x32xf32> to vector<8x8xf32>
    %191 = vector.extract_strided_slice %189 {offsets = [0, 8], sizes = [8, 8], strides = [1, 1]} : vector<8x32xf32> to vector<8x8xf32>
    %192 = vector.extract_strided_slice %189 {offsets = [0, 16], sizes = [8, 8], strides = [1, 1]} : vector<8x32xf32> to vector<8x8xf32>
    %193 = vector.extract_strided_slice %189 {offsets = [0, 24], sizes = [8, 8], strides = [1, 1]} : vector<8x32xf32> to vector<8x8xf32>
    %194 = vector.shape_cast %190 : vector<8x8xf32> to vector<1x8x8xf32>
    %195 = vector.shape_cast %191 : vector<8x8xf32> to vector<1x8x8xf32>
    %196 = vector.shape_cast %192 : vector<8x8xf32> to vector<1x8x8xf32>
    %197 = vector.shape_cast %193 : vector<8x8xf32> to vector<1x8x8xf32>
    %198 = tpu.concatenate %194, %195, %196, %197 in 0 : vector<1x8x8xf32>, vector<1x8x8xf32>, vector<1x8x8xf32>, vector<1x8x8xf32> -> vector<4x8x8xf32>
    %199 = arith.truncf %198 : vector<4x8x8xf32> to vector<4x8x8xbf16>
    %200 = vector.extract_strided_slice %177 {offsets = [0, 64], sizes = [8, 32], strides = [1, 1]} : vector<8x96xf32> to vector<8x32xf32>
    %201 = vector.extract_strided_slice %200 {offsets = [0, 0], sizes = [8, 8], strides = [1, 1]} : vector<8x32xf32> to vector<8x8xf32>
    %202 = vector.extract_strided_slice %200 {offsets = [0, 8], sizes = [8, 8], strides = [1, 1]} : vector<8x32xf32> to vector<8x8xf32>
    %203 = vector.extract_strided_slice %200 {offsets = [0, 16], sizes = [8, 8], strides = [1, 1]} : vector<8x32xf32> to vector<8x8xf32>
    %204 = vector.extract_strided_slice %200 {offsets = [0, 24], sizes = [8, 8], strides = [1, 1]} : vector<8x32xf32> to vector<8x8xf32>
    %205 = vector.shape_cast %201 : vector<8x8xf32> to vector<1x8x8xf32>
    %206 = vector.shape_cast %202 : vector<8x8xf32> to vector<1x8x8xf32>
    %207 = vector.shape_cast %203 : vector<8x8xf32> to vector<1x8x8xf32>
    %208 = vector.shape_cast %204 : vector<8x8xf32> to vector<1x8x8xf32>
    %209 = tpu.concatenate %205, %206, %207, %208 in 0 : vector<1x8x8xf32>, vector<1x8x8xf32>, vector<1x8x8xf32>, vector<1x8x8xf32> -> vector<4x8x8xf32>
    %210 = arith.truncf %209 : vector<4x8x8xf32> to vector<4x8x8xbf16>
    %cst_61 = arith.constant dense<0.000000e+00> : vector<4x8x8xf32>
    %211 = tpu.matmul %188, %199, %cst_61 {dimension_numbers = #tpu.dot_dimension_numbers<[2], [2], [1], [1], [0, 0, 0, 1, 1, 1], [0], [0]>} : vector<4x8x8xbf16>, vector<4x8x8xbf16>, vector<4x8x8xf32> -> vector<4x8x8xf32>
    %cst_62 = arith.constant dense<0xFF800000> : vector<4x8xf32>
    %212 = vector.multi_reduction <maximumf>, %211, %cst_62 [2] : vector<4x8x8xf32> to vector<4x8xf32>
    %213 = vector.shape_cast %212 : vector<4x8xf32> to vector<4x8x1xf32>
    %214 = vector.broadcast %213 : vector<4x8x1xf32> to vector<4x8x8xf32>
    %215 = arith.subf %211, %214 : vector<4x8x8xf32>
    %216 = math.exp %215 : vector<4x8x8xf32>
    %cst_63 = arith.constant dense<0.000000e+00> : vector<4x8xf32>
    %217 = vector.multi_reduction <add>, %216, %cst_63 [2] : vector<4x8x8xf32> to vector<4x8xf32>
    %218 = vector.shape_cast %217 : vector<4x8xf32> to vector<4x8x1xf32>
    %219 = tpu.reciprocal %218 {approx = true} : vector<4x8x1xf32> -> vector<4x8x1xf32>
    %220 = vector.broadcast %219 : vector<4x8x1xf32> to vector<4x8x8xf32>
    %221 = arith.mulf %216, %220 : vector<4x8x8xf32>
    %222 = arith.truncf %221 : vector<4x8x8xf32> to vector<4x8x8xbf16>
    %cst_64 = arith.constant dense<0.000000e+00> : vector<4x8x8xf32>
    %223 = tpu.matmul %222, %210, %cst_64 {dimension_numbers = #tpu.dot_dimension_numbers<[2], [1], [1], [2], [0, 0, 0, 1, 1, 2], [0], [0]>} : vector<4x8x8xbf16>, vector<4x8x8xbf16>, vector<4x8x8xf32> -> vector<4x8x8xf32>
    %224 = vector.extract_strided_slice %223 {offsets = [0, 0, 0], sizes = [1, 8, 8], strides = [1, 1, 1]} : vector<4x8x8xf32> to vector<1x8x8xf32>
    %225 = vector.shape_cast %224 : vector<1x8x8xf32> to vector<8x8xf32>
    %226 = vector.extract_strided_slice %223 {offsets = [1, 0, 0], sizes = [1, 8, 8], strides = [1, 1, 1]} : vector<4x8x8xf32> to vector<1x8x8xf32>
    %227 = vector.shape_cast %226 : vector<1x8x8xf32> to vector<8x8xf32>
    %228 = vector.extract_strided_slice %223 {offsets = [2, 0, 0], sizes = [1, 8, 8], strides = [1, 1, 1]} : vector<4x8x8xf32> to vector<1x8x8xf32>
    %229 = vector.shape_cast %228 : vector<1x8x8xf32> to vector<8x8xf32>
    %230 = vector.extract_strided_slice %223 {offsets = [3, 0, 0], sizes = [1, 8, 8], strides = [1, 1, 1]} : vector<4x8x8xf32> to vector<1x8x8xf32>
    %231 = vector.shape_cast %230 : vector<1x8x8xf32> to vector<8x8xf32>
    %232 = tpu.concatenate %225, %227, %229, %231 in 1 : vector<8x8xf32>, vector<8x8xf32>, vector<8x8xf32>, vector<8x8xf32> -> vector<8x32xf32>
    %233 = arith.truncf %232 : vector<8x32xf32> to vector<8x32xbf16>
    %cst_65 = arith.constant dense<0.000000e+00> : vector<8x32xf32>
    %234 = tpu.matmul %233, %168, %cst_65 {dimension_numbers = #tpu.dot_dimension_numbers<[1], [0], [0], [1], [0, 0, 1, 1], [], []>} : vector<8x32xbf16>, vector<32x32xbf16>, vector<8x32xf32> -> vector<8x32xf32>
    %c13 = arith.constant 13 : index
    %c0_66 = arith.constant 0 : index
    %235 = vector.load %arg1[%c13, %c0_66] : memref<20x128xf32, #tpu.memory_space<vmem>>, vector<1x32xf32>
    %236 = vector.broadcast %235 : vector<1x32xf32> to vector<8x32xf32>
    %237 = arith.addf %234, %236 : vector<8x32xf32>
    %238 = arith.addf %237, %164 : vector<8x32xf32>
    %c14 = arith.constant 14 : index
    %c0_67 = arith.constant 0 : index
    %239 = vector.load %arg1[%c14, %c0_67] : memref<20x128xf32, #tpu.memory_space<vmem>>, vector<1x32xf32>
    %c15 = arith.constant 15 : index
    %c0_68 = arith.constant 0 : index
    %240 = vector.load %arg1[%c15, %c0_68] : memref<20x128xf32, #tpu.memory_space<vmem>>, vector<1x32xf32>
    %cst_69 = arith.constant dense<0.000000e+00> : vector<8xf32>
    %241 = vector.multi_reduction <add>, %238, %cst_69 [1] : vector<8x32xf32> to vector<8xf32>
    %242 = vector.shape_cast %241 : vector<8xf32> to vector<8x1xf32>
    %cst_70 = arith.constant 3.200000e+01 : f32
    %243 = vector.broadcast %cst_70 : f32 to vector<8x1xf32>
    %244 = arith.divf %242, %243 : vector<8x1xf32>
    %245 = vector.broadcast %244 : vector<8x1xf32> to vector<8x32xf32>
    %246 = arith.subf %238, %245 : vector<8x32xf32>
    %247 = arith.mulf %246, %246 : vector<8x32xf32>
    %cst_71 = arith.constant dense<0.000000e+00> : vector<8xf32>
    %248 = vector.multi_reduction <add>, %247, %cst_71 [1] : vector<8x32xf32> to vector<8xf32>
    %249 = vector.shape_cast %248 : vector<8xf32> to vector<8x1xf32>
    %cst_72 = arith.constant 3.200000e+01 : f32
    %250 = vector.broadcast %cst_72 : f32 to vector<8x1xf32>
    %251 = arith.divf %249, %250 : vector<8x1xf32>
    %cst_73 = arith.constant 9.99999996E-13 : f32
    %252 = vector.broadcast %cst_73 : f32 to vector<8x1xf32>
    %253 = arith.addf %251, %252 : vector<8x1xf32>
    %254 = math.rsqrt %253 : vector<8x1xf32>
    %255 = vector.broadcast %254 : vector<8x1xf32> to vector<8x32xf32>
    %256 = arith.mulf %246, %255 : vector<8x32xf32>
    %257 = vector.broadcast %239 : vector<1x32xf32> to vector<8x32xf32>
    %258 = arith.mulf %256, %257 : vector<8x32xf32>
    %259 = vector.broadcast %240 : vector<1x32xf32> to vector<8x32xf32>
    %260 = arith.addf %258, %259 : vector<8x32xf32>
    %261 = arith.truncf %260 : vector<8x32xf32> to vector<8x32xbf16>
    %cst_74 = arith.constant dense<0.000000e+00> : vector<8x64xf32>
    %262 = tpu.matmul %261, %170, %cst_74 {dimension_numbers = #tpu.dot_dimension_numbers<[1], [0], [0], [1], [0, 0, 1, 1], [], []>} : vector<8x32xbf16>, vector<32x64xbf16>, vector<8x64xf32> -> vector<8x64xf32>
    %c16 = arith.constant 16 : index
    %c0_75 = arith.constant 0 : index
    %263 = vector.load %arg1[%c16, %c0_75] : memref<20x128xf32, #tpu.memory_space<vmem>>, vector<1x64xf32>
    %264 = vector.broadcast %263 : vector<1x64xf32> to vector<8x64xf32>
    %265 = arith.addf %262, %264 : vector<8x64xf32>
    %cst_76 = arith.constant 5.000000e-01 : f32
    %266 = vector.broadcast %cst_76 : f32 to vector<8x64xf32>
    %267 = arith.mulf %266, %265 : vector<8x64xf32>
    %cst_77 = arith.constant 4.471500e-02 : f32
    %268 = vector.broadcast %cst_77 : f32 to vector<8x64xf32>
    %269 = arith.mulf %268, %265 : vector<8x64xf32>
    %270 = arith.mulf %269, %265 : vector<8x64xf32>
    %271 = arith.mulf %270, %265 : vector<8x64xf32>
    %272 = arith.addf %265, %271 : vector<8x64xf32>
    %cst_78 = arith.constant 0.797884583 : f32
    %273 = vector.broadcast %cst_78 : f32 to vector<8x64xf32>
    %274 = arith.mulf %273, %272 : vector<8x64xf32>
    %275 = math.tanh %274 : vector<8x64xf32>
    %cst_79 = arith.constant 1.000000e+00 : f32
    %276 = vector.broadcast %cst_79 : f32 to vector<8x64xf32>
    %277 = arith.addf %276, %275 : vector<8x64xf32>
    %278 = arith.mulf %267, %277 : vector<8x64xf32>
    %279 = arith.truncf %278 : vector<8x64xf32> to vector<8x64xbf16>
    %cst_80 = arith.constant dense<0.000000e+00> : vector<8x32xf32>
    %280 = tpu.matmul %279, %172, %cst_80 {dimension_numbers = #tpu.dot_dimension_numbers<[1], [0], [0], [1], [0, 0, 1, 1], [], []>} : vector<8x64xbf16>, vector<64x32xbf16>, vector<8x32xf32> -> vector<8x32xf32>
    %c17 = arith.constant 17 : index
    %c0_81 = arith.constant 0 : index
    %281 = vector.load %arg1[%c17, %c0_81] : memref<20x128xf32, #tpu.memory_space<vmem>>, vector<1x32xf32>
    %282 = vector.broadcast %281 : vector<1x32xf32> to vector<8x32xf32>
    %283 = arith.addf %280, %282 : vector<8x32xf32>
    %284 = arith.addf %283, %260 : vector<8x32xf32>
    %c18 = arith.constant 18 : index
    %c0_82 = arith.constant 0 : index
    %285 = vector.load %arg1[%c18, %c0_82] : memref<20x128xf32, #tpu.memory_space<vmem>>, vector<1x32xf32>
    %c19 = arith.constant 19 : index
    %c0_83 = arith.constant 0 : index
    %286 = vector.load %arg1[%c19, %c0_83] : memref<20x128xf32, #tpu.memory_space<vmem>>, vector<1x32xf32>
    %cst_84 = arith.constant dense<0.000000e+00> : vector<8xf32>
    %287 = vector.multi_reduction <add>, %284, %cst_84 [1] : vector<8x32xf32> to vector<8xf32>
    %288 = vector.shape_cast %287 : vector<8xf32> to vector<8x1xf32>
    %cst_85 = arith.constant 3.200000e+01 : f32
    %289 = vector.broadcast %cst_85 : f32 to vector<8x1xf32>
    %290 = arith.divf %288, %289 : vector<8x1xf32>
    %291 = vector.broadcast %290 : vector<8x1xf32> to vector<8x32xf32>
    %292 = arith.subf %284, %291 : vector<8x32xf32>
    %293 = arith.mulf %292, %292 : vector<8x32xf32>
    %cst_86 = arith.constant dense<0.000000e+00> : vector<8xf32>
    %294 = vector.multi_reduction <add>, %293, %cst_86 [1] : vector<8x32xf32> to vector<8xf32>
    %295 = vector.shape_cast %294 : vector<8xf32> to vector<8x1xf32>
    %cst_87 = arith.constant 3.200000e+01 : f32
    %296 = vector.broadcast %cst_87 : f32 to vector<8x1xf32>
    %297 = arith.divf %295, %296 : vector<8x1xf32>
    %cst_88 = arith.constant 9.99999996E-13 : f32
    %298 = vector.broadcast %cst_88 : f32 to vector<8x1xf32>
    %299 = arith.addf %297, %298 : vector<8x1xf32>
    %300 = math.rsqrt %299 : vector<8x1xf32>
    %301 = vector.broadcast %300 : vector<8x1xf32> to vector<8x32xf32>
    %302 = arith.mulf %292, %301 : vector<8x32xf32>
    %303 = vector.broadcast %285 : vector<1x32xf32> to vector<8x32xf32>
    %304 = arith.mulf %302, %303 : vector<8x32xf32>
    %305 = vector.broadcast %286 : vector<1x32xf32> to vector<8x32xf32>
    %306 = arith.addf %304, %305 : vector<8x32xf32>
    %c0_89 = arith.constant 0 : index
    %c0_90 = arith.constant 0 : index
    %307 = vector.load %arg3[%c0_89, %c0_90] : memref<32x256xbf16, #tpu.memory_space<vmem>>, vector<32x32xbf16>
    %c0_91 = arith.constant 0 : index
    %c128_92 = arith.constant 128 : index
    %308 = vector.load %arg3[%c0_91, %c128_92] : memref<32x256xbf16, #tpu.memory_space<vmem>>, vector<32x128xbf16>
    %309 = vector.extract_strided_slice %306 {offsets = [0, 0], sizes = [1, 32], strides = [1, 1]} : vector<8x32xf32> to vector<1x32xf32>
    %310 = arith.truncf %309 : vector<1x32xf32> to vector<1x32xbf16>
    %cst_93 = arith.constant dense<0.000000e+00> : vector<1x32xf32>
    %311 = tpu.matmul %310, %307, %cst_93 {dimension_numbers = #tpu.dot_dimension_numbers<[1], [0], [0], [1], [0, 0, 1, 1], [], []>} : vector<1x32xbf16>, vector<32x32xbf16>, vector<1x32xf32> -> vector<1x32xf32>
    %c2 = arith.constant 2 : index
    %c0_94 = arith.constant 0 : index
    %312 = vector.load %arg1[%c2, %c0_94] : memref<20x128xf32, #tpu.memory_space<vmem>>, vector<1x32xf32>
    %313 = arith.addf %311, %312 : vector<1x32xf32>
    %314 = math.tanh %313 : vector<1x32xf32>
    %315 = arith.truncf %314 : vector<1x32xf32> to vector<1x32xbf16>
    %cst_95 = arith.constant dense<0.000000e+00> : vector<1x128xf32>
    %316 = tpu.matmul %315, %308, %cst_95 {dimension_numbers = #tpu.dot_dimension_numbers<[1], [0], [0], [1], [0, 0, 1, 1], [], []>} : vector<1x32xbf16>, vector<32x128xbf16>, vector<1x128xf32> -> vector<1x128xf32>
    %c3 = arith.constant 3 : index
    %c0_96 = arith.constant 0 : index
    %317 = vector.load %arg1[%c3, %c0_96] : memref<20x128xf32, #tpu.memory_space<vmem>>, vector<1x128xf32>
    %318 = arith.addf %316, %317 : vector<1x128xf32>
    %c0_97 = arith.constant 0 : index
    %c0_98 = arith.constant 0 : index
    %319 = vector.load %arg4[%c0_97, %c0_98] : memref<1x128xf32, #tpu.memory_space<vmem>>, vector<1x128xf32>
    tpu.vector_store %arg4[%c0_97, %c0_98], %318 {strides = array<i32>} : memref<1x128xf32, #tpu.memory_space<vmem>>, vector<1x128xf32>,
    return
  }
}

</mosaic_0001>

<bundles_post_ra>
// kernel: my_model_forward.1
= control target key start
LH: loop header
LB: loop body
LE: loop exit
PB: predicated region body
PF: predicated region fallthrough
CT: control target
= control target key end

     0   :  { %9 = vsyncpa [#allocation3], 0  ;;  %s2223_s15 = smov [#allocation2]   ;;  %s2576_s0 = inlined_call_operand.vmem [shape: f32[8,32], index: 0, kind: input, shape index: {}]   ;;  %s2577_s1 = inlined_call_operand.vmem [shape: f32[20,128], index: 1, kind: input, shape index: {}]   ;;  %s2578_s2 = inlined_call_operand.hbm [shape: bf16[2,64,512], index: 2, kind: input, shape index: {}]   ;;  %s2579_s3 = inlined_call_operand.vmem [shape: bf16[32,256], index: 3, kind: input, shape index: {}]   ;;  %s2580_s4 = inlined_call_operand.vmem [shape: f32[1,128], index: 4, kind: output, shape index: {}]  }
   0x1   :  { %s19_s16 = sshll.u32 %s2223_s15, 4  ;;  %s20_s16 = int_to_ptr.vmem [resolvable:$true] %s19_s16 }
   0x2   :  { %s2209_s17 = scalar_lea.vmem %s20_s16, 4096  ;;  %p2214_p1 = scmp.lt.s32.totalorder %s20_s16, %s20_s16 }
   0x3   :  { %p2210_p0 = scmp.ne.s32.totalorder %s20_s16, %s2209_s17  ;;  %p2215_p2 = scmp.lt.s32.totalorder %s2209_s17, %s2209_s17 }
   0x5   :  { %p2216_p3 = por %p2215_p2, %p2214_p1 }
   0x7   :  { %p2217_p4 = pnand %p2216_p3, %p2210_p0 }
   0x9   :  { %2220 = shalt.err (!%p2217_p4)
}
   0xa   :  { %s2224_s18 = smov 256   ;;  %s2225_s19 = smov 16  }
   0xb   :  { %25 = dma.hbm_to_vmem [thread:$0]  %s2578_s2, 4096, %s20_s16, [#allocation3], %s2224_s18, %s2224_s18, %s2225_s19  }
   0xc   :  { %2221 = dma.done.wait [#allocation3], 4096  }
   0xd   :  { %2222 = vsyncadd [#allocation3], 4294963200  ;;  %vm35_vm0 = vcmask 261120   ;;  %v32_v0 = vld [vmem:[%s2576_s0] sm:$0xff]  ;;  %v2226_v8 = vmov 0.0   ;;  %vm2227_vm1 = vmmov 0  }
   0xe   :  { %v36_v1 = vsel %vm35_vm0, %v32_v0, 0.0  ;;  %v2129_v7 = vld [vmem:[#allocation2 + $0x20] ss:$16 sps:$4 sm:$0xff]   ;;  %1933 = vmatprep.subr.bf16.mxu0 %v2226_v8  ;;  %1937 = vmatprep.mubr.msk.bf16.mxu0 %vm2227_vm1, %v2226_v8  ;;  %v1801_v20 = vld [vmem:[%s2577_s1 + $0x4] ss:$0 sm:$0xff]  ;;  %s2228_s28 = smov 104  }
   0xf   :  { %37 = vadd.xlane.f32.xlu0 %v36_v1  ;;  %1934 = vmatpush3.bf16.msra.mxu0 %v2129_v7  ;;  %v2130_v9 = vld [vmem:[#allocation2] ss:$16 sps:$4 sm:$0xff]   ;;  %s2229_s29 = smov 120   ;;  %s2230_s30 = smov 112   ;;  %vm158_vm2 = vcmask 64512   ;;  %vm405_vm3 = vcmask 1043456  }
  0x10   :  { %1941 = vmatprep.subr.bf16.mxu1 %v2226_v8  ;;  %1935 = vmatprep.subr.bf16.mxu0 %v2226_v8  ;;  %v1799_v14 = vld [vmem:[%s2577_s1] ss:$0 sm:$0xff]  ;;  %v1800_v16 = vld [vmem:[%s2577_s1 + $0x1] ss:$0 sm:$0xff]  ;;  %s2231_s5 = smov 96   ;;  %s2232_s6 = smov 64  }
  0x11   :  { %1943 = vmatprep.mubr.msk.bf16.mxu1 %vm2227_vm1, %v2226_v8  ;;  %s2233_s7 = smov 8   ;;  %s2234_s8 = smov 24   ;;  %vm606_vm4 = vcmask 130048   ;;  %vm608_vm5 = vcmask 195584   ;;  %vm797_vm6 = vcmask 523264  }
  0x13   :  { %1936 = vmatpush3.bf16.msra.mxu0 %v2130_v9 }
  0x14   :  { %1947 = vmatprep.subr.bf16.mxu0 %v2226_v8 }
  0x98   :  { %v38_v2 = vpop.xlane.xlu0 %37 }
  0x99   :  { %v40_v3 = vmul.f32 0.03125, %v38_v2 }
  0x9b   :  { %v41_v4 = vsub.f32 %v32_v0, %v40_v3 }
  0x9d   :  { %v42_v5 = vmul.f32 %v41_v4, %v41_v4 }
  0x9f   :  { %v43_v6 = vsel %vm35_vm0, %v42_v5, 0.0 }
  0xa0   :  { %44 = vadd.xlane.f32.xlu0 %v43_v6 }
 0x129   :  { %v45_v10 = vpop.xlane.xlu0 %44 }
 0x12a   :  { %v46_v11 = vmul.f32 0.03125, %v45_v10 }
 0x12c   :  { %v47_v12 = vadd.f32 1e-12, %v46_v11 }
 0x12e   :  { %2153 = vrsqrt.f32 %v47_v12 }
 0x13b   :  { %v2154_v13 = vpop.eup %2153 }
 0x13c   :  { %v49_v15 = vmul.f32 %v2154_v13, %v41_v4 }
 0x13e   :  { %v54_v17 = vmul.f32 %v1799_v14, %v49_v15 }
 0x140   :  { %v2283_v18 = vadd.f32 %v1800_v16, %v54_v17 }
 0x142   :  { %v80_v19 = vpack.c.bf16 %v2283_v18, %v2283_v18 }
 0x144   :  { %1938 = vmatmul.mubr.msk.bf16.vlgmr.msra.gmra.mxu0 %vm35_vm0, %v80_v19 }
 0x145   :  { %1949 = vmatprep.mubr.msk.bf16.mxu0 %vm2227_vm1, %v2226_v8 }
 0x204   :  { %v135_v21 = vpop.f32.mrf.mxu0 }
 0x205   :  { %v136_v22 = vadd.f32 %v1801_v20, %v135_v21 }
 0x206   :  { %v1939_v23 = vpop.f32.mrf.mxu0 }
 0x207   :  { %148 = vrot.lane.b32.xlu0 %v136_v22, %s2228_s28  ;;  %142 = vrot.lane.b32.xlu1 %v136_v22, %s2229_s29  ;;  %v151_v26 = vpack.c.bf16 %v136_v22, %v136_v22 }
 0x208   :  { %v138_v24 = vpop.f32.mrf.mxu0 }
 0x20a   :  { %v1940_v25 = vpop.f32.mrf.mxu0 }
 0x20b   :  { %145 = vrot.lane.b32.xlu1 %v136_v22, %s2230_s30 }
 0x20f   :  { %156 = vrot.lane.b32.xlu1 %v151_v26, %s2231_s5 }
 0x279   :  { %v143_v27 = vpop.permute.xlu1 %142  ;;  %v149_v31 = vpop.permute.xlu0 %148 }
 0x27a   :  { %v2297_v28 = vpack.c.bf16 %v143_v27, %v143_v27  ;;  %v2305_v33 = vpack.c.bf16 %v149_v31, %v149_v31 }
 0x27c   :  { %206 = vrot.lane.b32.xlu1 %v2297_v28, %s2231_s5 }
 0x27d   :  { %v146_v29 = vpop.permute.xlu1 %145 }
 0x27e   :  { %v2301_v30 = vpack.c.bf16 %v146_v29, %v146_v29 }
 0x280   :  { %255 = vrot.lane.b32.xlu1 %v2301_v30, %s2231_s5 }
 0x281   :  { %v157_v32 = vpop.permute.xlu1 %156 }
 0x282   :  { %v163_v34 = vsel %vm158_vm2, %v157_v32, 0 }
 0x283   :  { %1942 = vmatpush3.bf16.xpose.msra.mxu1 %v163_v34 }
 0x284   :  { %304 = vrot.lane.b32.xlu1 %v2305_v33, %s2231_s5  ;;  %1953 = vmatprep.subr.bf16.mxu1 %v2226_v8 }
 0x28a   :  { %1944 = vmatmul.mubr.msk.bf16.vlgmr.msra.gmra.mxu1 %vm158_vm2, %v151_v26 }
 0x28b   :  { %1955 = vmatprep.mubr.msk.bf16.mxu1 %vm2227_vm1, %v2226_v8 }
 0x2ee   :  { %v207_v35 = vpop.permute.xlu1 %206 }
 0x2ef   :  { %v212_v36 = vsel %vm158_vm2, %v207_v35, 0 }
 0x2f0   :  { %1948 = vmatpush3.bf16.xpose.msra.mxu0 %v212_v36 }
 0x2f1   :  { %1959 = vmatprep.subr.bf16.mxu0 %v2226_v8 }
 0x2f2   :  { %v256_v37 = vpop.permute.xlu1 %255 }
 0x2f3   :  { %v261_v38 = vsel %vm158_vm2, %v256_v37, 0 }
 0x2f4   :  { %1954 = vmatpush3.bf16.xpose.msra.mxu1 %v261_v38 }
 0x2f5   :  { %1965 = vmatprep.subr.bf16.mxu1 %v2226_v8 }
 0x2f6   :  { %v305_v39 = vpop.permute.xlu1 %304 }
 0x2f7   :  { %v310_v40 = vsel %vm158_vm2, %v305_v39, 0  ;;  %1950 = vmatmul.mubr.msk.bf16.vlgmr.msra.gmra.mxu0 %vm158_vm2, %v2297_v28 }
 0x2f8   :  { %1960 = vmatpush3.bf16.xpose.msra.mxu0 %v310_v40  ;;  %1961 = vmatprep.mubr.msk.bf16.mxu0 %vm2227_vm1, %v2226_v8 }
 0x2f9   :  { %1971 = vmatprep.subr.bf16.mxu0 %v2226_v8 }
 0x2fb   :  { %1956 = vmatmul.mubr.msk.bf16.vlgmr.msra.gmra.mxu1 %vm158_vm2, %v2301_v30 }
 0x2fc   :  { %1967 = vmatprep.mubr.msk.bf16.mxu1 %vm2227_vm1, %v2226_v8 }
 0x2ff   :  { %1962 = vmatmul.mubr.msk.bf16.vlgmr.msra.gmra.mxu0 %vm158_vm2, %v2305_v33 }
 0x300   :  { %1973 = vmatprep.mubr.msk.bf16.mxu0 %vm2227_vm1, %v2226_v8 }
 0x34a   :  { %v199_v41 = vpop.f32.mrf.mxu1 }
 0x34b   :  { %v352_v42 = vsel %vm158_vm2, %v199_v41, -inf }
 0x34c   :  { %353 = vmax.xlane.f32.xlu1 %v352_v42  ;;  %v1945_v43 = vpop.f32.mrf.mxu1 }
 0x34e   :  { %v202_v44 = vpop.f32.mrf.mxu1 }
 0x350   :  { %v1946_v45 = vpop.f32.mrf.mxu1 }
 0x3b7   :  { %v248_v46 = vpop.f32.mrf.mxu0 }
 0x3b8   :  { %v355_v47 = vsel %vm158_vm2, %v248_v46, -inf }
 0x3b9   :  { %356 = vmax.xlane.f32.xlu0 %v355_v47  ;;  %v1951_v48 = vpop.f32.mrf.mxu0  ;;  %v2131_v47 = vld [vmem:[#allocation2 + $0x24] ss:$16 sps:$4 sm:$0xff]  }
 0x3ba   :  { %v2132_v48 = vld [vmem:[#allocation2 + $0x4] ss:$16 sps:$4 sm:$0xff]  }
 0x3bb   :  { %v251_v49 = vpop.f32.mrf.mxu0  ;;  %v297_v50 = vpop.f32.mrf.mxu1 }
 0x3bc   :  { %v358_v51 = vsel %vm158_vm2, %v297_v50, -inf }
 0x3bd   :  { %359 = vmax.xlane.f32.xlu1 %v358_v51  ;;  %v1952_v52 = vpop.f32.mrf.mxu0  ;;  %v1957_v53 = vpop.f32.mrf.mxu1 }
 0x3bf   :  { %v300_v54 = vpop.f32.mrf.mxu1  ;;  %v346_v55 = vpop.f32.mrf.mxu0 }
 0x3c0   :  { %v361_v56 = vsel %vm158_vm2, %v346_v55, -inf }
 0x3c1   :  { %v1958_v57 = vpop.f32.mrf.mxu1  ;;  %362 = vmax.xlane.f32.xlu0 %v361_v56  ;;  %v1963_v58 = vpop.f32.mrf.mxu0 }
 0x3c3   :  { %v349_v59 = vpop.f32.mrf.mxu0 }
 0x3c5   :  { %v1964_v60 = vpop.f32.mrf.mxu0 }
 0x3ce   :  { %400 = vrot.lane.b32.xlu1 %v151_v26, %s2232_s6 }
 0x3d5   :  { %v354_v61 = vpop.xlane.xlu1 %353 }
 0x3d6   :  { %v364_v62 = vsub.f32 %v199_v41, %v354_v61 }
 0x3d8   :  { %v368_v63 = vmul.f32 1.442695, %v364_v62 }
 0x3da   :  { %2155 = vpow2.f32 %v368_v63 }
 0x3e7   :  { %v2156_v0 = vpop.eup %2155 }
 0x3e8   :  { %v376_v1 = vsel %vm158_vm2, %v2156_v0, 0.0 }
 0x3f2   :  { %377 = vadd.xlane.f32.xlu1 %v376_v1 }
 0x442   :  { %v357_v2 = vpop.xlane.xlu0 %356 }
 0x443   :  { %v365_v3 = vsub.f32 %v248_v46, %v357_v2 }
 0x445   :  { %v370_v4 = vmul.f32 1.442695, %v365_v3 }
 0x446   :  { %v360_v5 = vpop.xlane.xlu1 %359 }
 0x447   :  { %2157 = vpow2.f32 %v370_v4  ;;  %v366_v6 = vsub.f32 %v297_v50, %v360_v5  ;;  %v1813_v4 = vld [vmem:[%s2577_s1 + $0x5] ss:$0 sm:$0xff] }
 0x449   :  { %v372_v7 = vmul.f32 1.442695, %v366_v6 }
 0x44a   :  { %v401_v9 = vpop.permute.xlu1 %400  ;;  %v363_v10 = vpop.xlane.xlu0 %362 }
 0x44b   :  { %2159 = vpow2.f32 %v372_v7  ;;  %v407_v11 = vsel %vm405_vm3, %v401_v9, 0  ;;  %v367_v12 = vsub.f32 %v346_v55, %v363_v10 }
 0x44c   :  { %1966 = vmatpush3.bf16.msra.mxu1 %v407_v11 }
 0x44d   :  { %v374_v13 = vmul.f32 1.442695, %v367_v12  ;;  %1977 = vmatprep.subr.bf16.mxu1 %v2226_v8 }
 0x44f   :  { %2161 = vpow2.f32 %v374_v13 }
 0x454   :  { %v2158_v14 = vpop.eup %2157 }
 0x455   :  { %v379_v15 = vsel %vm158_vm2, %v2158_v14, 0.0 }
 0x456   :  { %380 = vadd.xlane.f32.xlu0 %v379_v15 }
 0x458   :  { %v2160_v16 = vpop.eup %2159 }
 0x459   :  { %v382_v17 = vsel %vm158_vm2, %v2160_v16, 0.0 }
 0x45a   :  { %383 = vadd.xlane.f32.xlu1 %v382_v17 }
 0x45c   :  { %v2162_v19 = vpop.eup %2161 }
 0x45d   :  { %v385_v20 = vsel %vm158_vm2, %v2162_v19, 0.0 }
 0x45e   :  { %386 = vadd.xlane.f32.xlu0 %v385_v20  ;;  %v2134_v20 = vld [vmem:[#allocation2 + $0x8] ss:$16 sps:$4 sm:$0xff]  }
 0x46b   :  { %497 = vrot.lane.b32.xlu1 %v2301_v30, %s2232_s6 }
 0x46f   :  { %545 = vrot.lane.b32.xlu1 %v2305_v33, %s2232_s6 }
 0x474   :  { %449 = vrot.lane.b32.xlu0 %v2297_v28, %s2232_s6 }
 0x47b   :  { %v378_v21 = vpop.xlane.xlu1 %377 }
 0x47c   :  { %2163 = vrcp.f32 %v378_v21 }
 0x489   :  { %v2164_v22 = vpop.eup %2163 }
 0x48a   :  { %v392_v23 = vmul.f32 %v2164_v22, %v2156_v0 }
 0x48c   :  { %v396_v24 = vpack.c.bf16 %v392_v23, %v392_v23 }
 0x48e   :  { %1968 = vmatmul.mubr.msk.bf16.vlgmr.msra.gmra.mxu1 %vm158_vm2, %v396_v24  ;;  %v1817_v24 = vld [vmem:[%s2577_s1 + $0x6] ss:$0 sm:$0xff] }
 0x48f   :  { %1979 = vmatprep.mubr.msk.bf16.mxu1 %vm2227_vm1, %v2226_v8 }
 0x4df   :  { %v381_v25 = vpop.xlane.xlu0 %380 }
 0x4e0   :  { %2165 = vrcp.f32 %v381_v25 }
 0x4e3   :  { %v384_v26 = vpop.xlane.xlu1 %383 }
 0x4e4   :  { %2167 = vrcp.f32 %v384_v26  ;;  %v1818_v26 = vld [vmem:[%s2577_s1 + $0x7] ss:$0 sm:$0xff] }
 0x4e7   :  { %v498_v27 = vpop.permute.xlu1 %497  ;;  %v387_v29 = vpop.xlane.xlu0 %386 }
 0x4e8   :  { %v503_v30 = vsel %vm405_vm3, %v498_v27, 0  ;;  %2169 = vrcp.f32 %v387_v29 }
 0x4e9   :  { %1978 = vmatpush3.bf16.msra.mxu1 %v503_v30 }
 0x4ea   :  { %1989 = vmatprep.subr.bf16.mxu1 %v2226_v8 }
 0x4eb   :  { %v450_v28 = vpop.permute.xlu0 %449  ;;  %v546_v34 = vpop.permute.xlu1 %545 }
 0x4ec   :  { %v455_v31 = vsel %vm405_vm3, %v450_v28, 0  ;;  %v551_v37 = vsel %vm405_vm3, %v546_v34, 0  ;;  %v2135_v28 = vld [vmem:[#allocation2 + $0x6c] ss:$16 sps:$4 sm:$0xff]   ;;  %v1819_v34 = vld [vmem:[%s2577_s1 + $0x8] ss:$0 sm:$0xff] }
 0x4ed   :  { %v2166_v32 = vpop.eup %2165  ;;  %1972 = vmatpush3.bf16.msra.mxu0 %v455_v31  ;;  %v2136_v31 = vld [vmem:[#allocation2 + $0x4c] ss:$16 sps:$4 sm:$0xff]  }
 0x4ee   :  { %1983 = vmatprep.subr.bf16.mxu0 %v2226_v8  ;;  %v393_v33 = vmul.f32 %v2166_v32, %v2158_v14  ;;  %v2137_v32 = vld [vmem:[#allocation2 + $0x2c] ss:$16 sps:$4 sm:$0xff]  }
 0x4f0   :  { %v397_v35 = vpack.c.bf16 %v393_v33, %v393_v33  ;;  %v2138_v33 = vld [vmem:[#allocation2 + $0xc] ss:$16 sps:$4 sm:$0xff]  }
 0x4f1   :  { %v2168_v36 = vpop.eup %2167 }
 0x4f2   :  { %1974 = vmatmul.mubr.msk.bf16.vlgmr.msra.gmra.mxu0 %vm158_vm2, %v397_v35  ;;  %v394_v38 = vmul.f32 %v2168_v36, %v2160_v16 }
 0x4f3   :  { %1984 = vmatpush3.bf16.msra.mxu0 %v551_v37  ;;  %1985 = vmatprep.mubr.msk.bf16.mxu0 %vm2227_vm1, %v2226_v8 }
 0x4f4   :  { %v398_v39 = vpack.c.bf16 %v394_v38, %v394_v38  ;;  %1997 = vmatprep.subr.bf16.mxu0 %v2226_v8 }
 0x4f5   :  { %v2170_v40 = vpop.eup %2169 }
 0x4f6   :  { %1980 = vmatmul.mubr.msk.bf16.vlgmr.msra.gmra.mxu1 %vm158_vm2, %v398_v39  ;;  %v395_v41 = vmul.f32 %v2170_v40, %v2162_v19  ;;  %v2133_v19 = vld [vmem:[#allocation2 + $0x28] ss:$16 sps:$4 sm:$0xff]  }
 0x4f7   :  { %1993 = vmatprep.mubr.msk.bf16.mxu1 %vm2227_vm1, %v2226_v8  ;;  %1990 = vmatpush3.bf16.msra.mxu1 %v2131_v47 }
 0x4f8   :  { %v399_v42 = vpack.c.bf16 %v395_v41, %v395_v41  ;;  %1991 = vmatprep.subr.bf16.mxu1 %v2226_v8 }
 0x4fa   :  { %1986 = vmatmul.mubr.msk.bf16.vlgmr.msra.gmra.mxu0 %vm158_vm2, %v399_v42 }
 0x4fb   :  { %2001 = vmatprep.mubr.msk.bf16.mxu0 %vm2227_vm1, %v2226_v8  ;;  %1992 = vmatpush3.bf16.msra.mxu1 %v2132_v48 }
 0x4fc   :  { %2005 = vmatprep.subr.bf16.mxu1 %v2226_v8  ;;  %1998 = vmatpush3.bf16.msra.mxu0 %v2133_v19 }
 0x4fd   :  { %1999 = vmatprep.subr.bf16.mxu0 %v2226_v8 }
 0x500   :  { %2000 = vmatpush3.bf16.msra.mxu0 %v2134_v20 }
 0x501   :  { %2017 = vmatprep.subr.bf16.mxu0 %v2226_v8 }
 0x54e   :  { %v443_v43 = vpop.f32.mrf.mxu1 }
 0x550   :  { %v1969_v44 = vpop.f32.mrf.mxu1 }
 0x552   :  { %v446_v45 = vpop.f32.mrf.mxu1 }
 0x554   :  { %v1970_v46 = vpop.f32.mrf.mxu1 }
 0x5b2   :  { %v491_v49 = vpop.f32.mrf.mxu0 }
 0x5b3   :  { %594 = vrot.lane.b32.xlu0 %v491_v49, %s2233_s7 }
 0x5b4   :  { %v1975_v50 = vpop.f32.mrf.mxu0 }
 0x5b5   :  { %v1823_v50 = vld [vmem:[%s2577_s1 + $0x9] ss:$0 sm:$0xff] }
 0x5b6   :  { %v494_v51 = vpop.f32.mrf.mxu0  ;;  %v539_v52 = vpop.f32.mrf.mxu1 }
 0x5b7   :  { %598 = vrot.lane.b32.xlu1 %v539_v52, %s2225_s19 }
 0x5b8   :  { %v1976_v53 = vpop.f32.mrf.mxu0  ;;  %v1981_v54 = vpop.f32.mrf.mxu1 }
 0x5ba   :  { %v542_v55 = vpop.f32.mrf.mxu1  ;;  %v587_v56 = vpop.f32.mrf.mxu0 }
 0x5bb   :  { %602 = vrot.lane.b32.xlu0 %v587_v56, %s2234_s8 }
 0x5bc   :  { %v1982_v57 = vpop.f32.mrf.mxu1  ;;  %v1987_v58 = vpop.f32.mrf.mxu0 }
 0x5be   :  { %v590_v59 = vpop.f32.mrf.mxu0 }
 0x5c0   :  { %v1988_v60 = vpop.f32.mrf.mxu0 }
 0x625   :  { %v595_v61 = vpop.permute.xlu0 %594 }
 0x626   :  { %v605_v63 = vsel %vm158_vm2, %v443_v43, %v595_v61 }
 0x629   :  { %v599_v62 = vpop.permute.xlu1 %598 }
 0x62a   :  { %v607_v0 = vsel %vm606_vm4, %v605_v63, %v599_v62  ;;  %v2139_v63 = vld [vmem:[#allocation2 + $0xa0] ss:$16 sps:$4 sm:$0xff]  }
 0x62d   :  { %v603_v1 = vpop.permute.xlu0 %602 }
 0x62e   :  { %v609_v2 = vsel %vm608_vm5, %v607_v0, %v603_v1  ;;  %v2140_v0 = vld [vmem:[#allocation2 + $0x80] ss:$16 sps:$4 sm:$0xff]  }
 0x62f   :  { %v610_v3 = vpack.c.bf16 %v609_v2, %v609_v2 }
 0x631   :  { %1994 = vmatmul.mubr.msk.bf16.vlgmr.msra.gmra.mxu1 %vm35_vm0, %v610_v3 }
 0x632   :  { %2013 = vmatprep.mubr.msk.bf16.mxu1 %vm2227_vm1, %v2226_v8  ;;  %2006 = vmatpush3.bf16.msra.mxu1 %v2135_v28 }
 0x633   :  { %2007 = vmatprep.subr.bf16.mxu1 %v2226_v8 }
 0x636   :  { %2008 = vmatpush3.bf16.msra.mxu1 %v2136_v31 }
 0x637   :  { %2009 = vmatprep.subr.bf16.mxu1 %v2226_v8 }
 0x63a   :  { %2010 = vmatpush3.bf16.msra.mxu1 %v2137_v32 }
 0x63b   :  { %2011 = vmatprep.subr.bf16.mxu1 %v2226_v8 }
 0x63e   :  { %2012 = vmatpush3.bf16.msra.mxu1 %v2138_v33 }
 0x63f   :  { %2031 = vmatprep.subr.bf16.mxu1 %v2226_v8 }
 0x6f1   :  { %v665_v5 = vpop.f32.mrf.mxu1 }
 0x6f2   :  { %v666_v6 = vadd.f32 %v1813_v4, %v665_v5  ;;  %v1829_v5 = vld [vmem:[%s2577_s1 + $0xa] ss:$0 sm:$0xff] }
 0x6f3   :  { %v1995_v7 = vpop.f32.mrf.mxu1 }
 0x6f4   :  { %v671_v9 = vadd.f32 %v666_v6, %v2283_v18  ;;  %v1830_v7 = vld [vmem:[%s2577_s1 + $0xb] ss:$0 sm:$0xff] }
 0x6f5   :  { %v668_v10 = vpop.f32.mrf.mxu1 }
 0x6f6   :  { %v674_v11 = vsel %vm35_vm0, %v671_v9, 0.0 }
 0x6f7   :  { %675 = vadd.xlane.f32.xlu1 %v674_v11  ;;  %v1996_v12 = vpop.f32.mrf.mxu1 }
 0x6f8   :  { %v1831_v12 = vld [vmem:[%s2577_s1 + $0xc] ss:$0 sm:$0xff] }
 0x780   :  { %v676_v13 = vpop.xlane.xlu1 %675 }
 0x781   :  { %v677_v14 = vmul.f32 0.03125, %v676_v13 }
 0x783   :  { %v678_v15 = vsub.f32 %v671_v9, %v677_v14 }
 0x785   :  { %v679_v16 = vmul.f32 %v678_v15, %v678_v15 }
 0x787   :  { %v680_v17 = vsel %vm35_vm0, %v679_v16, 0.0 }
 0x788   :  { %681 = vadd.xlane.f32.xlu0 %v680_v17 }
 0x811   :  { %v682_v18 = vpop.xlane.xlu0 %681 }
 0x812   :  { %v683_v21 = vmul.f32 0.03125, %v682_v18 }
 0x814   :  { %v684_v22 = vadd.f32 1e-12, %v683_v21 }
 0x816   :  { %2171 = vrsqrt.f32 %v684_v22 }
 0x823   :  { %v2172_v23 = vpop.eup %2171 }
 0x824   :  { %v686_v25 = vmul.f32 %v2172_v23, %v678_v15 }
 0x826   :  { %v691_v27 = vmul.f32 %v1817_v24, %v686_v25 }
 0x828   :  { %v696_v29 = vadd.f32 %v1818_v26, %v691_v27 }
 0x82a   :  { %v697_v30 = vpack.c.bf16 %v696_v29, %v696_v29 }
 0x82c   :  { %2002 = vmatmul.mubr.msk.bf16.vlgmr.msra.gmra.mxu0 %vm35_vm0, %v697_v30 }
 0x82d   :  { %2021 = vmatprep.mubr.msk.bf16.mxu0 %vm2227_vm1, %v2226_v8  ;;  %2018 = vmatpush3.bf16.msra.mxu0 %v2139_v63 }
 0x82e   :  { %2019 = vmatprep.subr.bf16.mxu0 %v2226_v8 }
 0x831   :  { %2020 = vmatpush3.bf16.msra.mxu0 %v2140_v0 }
 0x832   :  { %2025 = vmatprep.subr.bf16.mxu0 %v2226_v8 }
 0x8ec   :  { %v752_v35 = vpop.f32.mrf.mxu0 }
 0x8ed   :  { %v753_v36 = vadd.f32 %v1819_v34, %v752_v35 }
 0x8ee   :  { %v2003_v37 = vpop.f32.mrf.mxu0 }
 0x8ef   :  { %v759_v38 = vmul.f32 0.044715, %v753_v36  ;;  %v758_v46 = vmul.f32 0.5, %v753_v36 }
 0x8f0   :  { %v755_v39 = vpop.f32.mrf.mxu0 }
 0x8f1   :  { %v760_v40 = vmul.f32 %v759_v38, %v753_v36 }
 0x8f2   :  { %v2004_v41 = vpop.f32.mrf.mxu0 }
 0x8f3   :  { %v761_v42 = vmul.f32 %v760_v40, %v753_v36 }
 0x8f5   :  { %v762_v43 = vadd.f32 %v761_v42, %v753_v36 }
 0x8f7   :  { %v763_v44 = vmul.f32 0.7978846, %v762_v43 }
 0x8f9   :  { %2173 = vtanh.f32 %v763_v44 }
 0x906   :  { %v2174_v45 = vpop.eup %2173 }
 0x907   :  { %v765_v47 = vadd.f32 1.0, %v2174_v45 }
 0x909   :  { %v766_v48 = vmul.f32 %v765_v47, %v758_v46 }
 0x90b   :  { %v767_v49 = vpack.c.bf16 %v766_v48, %v766_v48 }
 0x90d   :  { %2014 = vmatmul.mubr.msk.bf16.vlgmr.msra.gmra.mxu1 %vm797_vm6, %v767_v49 }
 0x90e   :  { %2033 = vmatprep.mubr.msk.bf16.mxu1 %vm2227_vm1, %v2226_v8 }
 0x9cd   :  { %v835_v51 = vpop.f32.mrf.mxu1 }
 0x9ce   :  { %v836_v52 = vadd.f32 %v1823_v50, %v835_v51 }
 0x9cf   :  { %v2015_v53 = vpop.f32.mrf.mxu1 }
 0x9d0   :  { %v841_v54 = vadd.f32 %v836_v52, %v696_v29 }
 0x9d1   :  { %v838_v55 = vpop.f32.mrf.mxu1 }
 0x9d2   :  { %v844_v56 = vsel %vm35_vm0, %v841_v54, 0.0 }
 0x9d3   :  { %845 = vadd.xlane.f32.xlu0 %v844_v56  ;;  %v2016_v57 = vpop.f32.mrf.mxu1 }
 0xa5c   :  { %v846_v58 = vpop.xlane.xlu0 %845 }
 0xa5d   :  { %v847_v59 = vmul.f32 0.03125, %v846_v58 }
 0xa5f   :  { %v848_v60 = vsub.f32 %v841_v54, %v847_v59 }
 0xa61   :  { %v849_v61 = vmul.f32 %v848_v60, %v848_v60 }
 0xa63   :  { %v850_v62 = vsel %vm35_vm0, %v849_v61, 0.0 }
 0xa64   :  { %851 = vadd.xlane.f32.xlu1 %v850_v62 }
 0xaed   :  { %v852_v1 = vpop.xlane.xlu1 %851 }
 0xaee   :  { %v853_v2 = vmul.f32 0.03125, %v852_v1 }
 0xaf0   :  { %v854_v3 = vadd.f32 1e-12, %v853_v2 }
 0xaf2   :  { %2175 = vrsqrt.f32 %v854_v3 }
 0xaff   :  { %v2176_v4 = vpop.eup %2175 }
 0xb00   :  { %v856_v6 = vmul.f32 %v2176_v4, %v848_v60 }
 0xb02   :  { %v861_v9 = vmul.f32 %v1829_v5, %v856_v6 }
 0xb04   :  { %v2418_v10 = vadd.f32 %v1830_v7, %v861_v9 }
 0xb06   :  { %v888_v11 = vpack.c.bf16 %v2418_v10, %v2418_v10 }
 0xb08   :  { %2022 = vmatmul.mubr.msk.bf16.vlgmr.msra.gmra.mxu0 %vm35_vm0, %v888_v11 }
 0xb09   :  { %2027 = vmatprep.mubr.msk.bf16.mxu0 %vm2227_vm1, %v2226_v8 }
 0xbc8   :  { %v943_v13 = vpop.f32.mrf.mxu0 }
 0xbc9   :  { %v944_v14 = vadd.f32 %v1831_v12, %v943_v13 }
 0xbca   :  { %v2023_v15 = vpop.f32.mrf.mxu0 }
 0xbcb   :  { %953 = vrot.lane.b32.xlu1 %v944_v14, %s2230_s30  ;;  %950 = vrot.lane.b32.xlu0 %v944_v14, %s2229_s29  ;;  %v959_v17 = vpack.c.bf16 %v944_v14, %v944_v14 }
 0xbcc   :  { %v946_v16 = vpop.f32.mrf.mxu0 }
 0xbce   :  { %v2024_v19 = vpop.f32.mrf.mxu0 }
 0xbcf   :  { %956 = vrot.lane.b32.xlu1 %v944_v14, %s2228_s28  ;;  %964 = vrot.lane.b32.xlu0 %v959_v17, %s2231_s5 }
 0xc3d   :  { %v954_v20 = vpop.permute.xlu1 %953  ;;  %v951_v18 = vpop.permute.xlu0 %950 }
 0xc3e   :  { %v2432_v21 = vpack.c.bf16 %v954_v20, %v954_v20  ;;  %v2434_v22 = vpack.c.bf16 %v951_v18, %v951_v18 }
 0xc40   :  { %1013 = vrot.lane.b32.xlu1 %v2434_v22, %s2231_s5  ;;  %1062 = vrot.lane.b32.xlu0 %v2432_v21, %s2231_s5 }
 0xc41   :  { %v957_v23 = vpop.permute.xlu1 %956  ;;  %v965_v24 = vpop.permute.xlu0 %964 }
 0xc42   :  { %v2440_v25 = vpack.c.bf16 %v957_v23, %v957_v23  ;;  %v970_v26 = vsel %vm158_vm2, %v965_v24, 0 }
 0xc43   :  { %2026 = vmatpush3.bf16.xpose.msra.mxu0 %v970_v26 }
 0xc44   :  { %1111 = vrot.lane.b32.xlu1 %v2440_v25, %s2231_s5  ;;  %2037 = vmatprep.subr.bf16.mxu0 %v2226_v8 }
 0xc4a   :  { %2028 = vmatmul.mubr.msk.bf16.vlgmr.msra.gmra.mxu0 %vm158_vm2, %v959_v17 }
 0xc4b   :  { %2039 = vmatprep.mubr.msk.bf16.mxu0 %vm2227_vm1, %v2226_v8 }
 0xcb2   :  { %v1014_v27 = vpop.permute.xlu1 %1013  ;;  %v1063_v29 = vpop.permute.xlu0 %1062 }
 0xcb3   :  { %v1019_v30 = vsel %vm158_vm2, %v1014_v27, 0  ;;  %v1068_v28 = vsel %vm158_vm2, %v1063_v29, 0 }
 0xcb4   :  { %2032 = vmatpush3.bf16.xpose.msra.mxu1 %v1019_v30  ;;  %2038 = vmatpush3.bf16.xpose.msra.mxu0 %v1068_v28 }
 0xcb5   :  { %2043 = vmatprep.subr.bf16.mxu1 %v2226_v8  ;;  %2049 = vmatprep.subr.bf16.mxu0 %v2226_v8 }
 0xcb6   :  { %v1112_v31 = vpop.permute.xlu1 %1111 }
 0xcb7   :  { %v1117_v32 = vsel %vm158_vm2, %v1112_v31, 0 }
 0xcbb   :  { %2034 = vmatmul.mubr.msk.bf16.vlgmr.msra.gmra.mxu1 %vm158_vm2, %v2434_v22  ;;  %2040 = vmatmul.mubr.msk.bf16.vlgmr.msra.gmra.mxu0 %vm158_vm2, %v2432_v21 }
 0xcbc   :  { %2044 = vmatpush3.bf16.xpose.msra.mxu1 %v1117_v32  ;;  %2045 = vmatprep.mubr.msk.bf16.mxu1 %vm2227_vm1, %v2226_v8 }
 0xcbd   :  { %2051 = vmatprep.mubr.msk.bf16.mxu0 %vm2227_vm1, %v2226_v8  ;;  %2055 = vmatprep.subr.bf16.mxu1 %v2226_v8 }
 0xcc3   :  { %2046 = vmatmul.mubr.msk.bf16.vlgmr.msra.gmra.mxu1 %vm158_vm2, %v2440_v25 }
 0xcc4   :  { %2057 = vmatprep.mubr.msk.bf16.mxu1 %vm2227_vm1, %v2226_v8 }
 0xd0a   :  { %v1006_v33 = vpop.f32.mrf.mxu0 }
 0xd0b   :  { %v1159_v34 = vsel %vm158_vm2, %v1006_v33, -inf }
 0xd0c   :  { %1160 = vmax.xlane.f32.xlu0 %v1159_v34  ;;  %v2029_v35 = vpop.f32.mrf.mxu0 }
 0xd0e   :  { %v1009_v36 = vpop.f32.mrf.mxu0 }
 0xd10   :  { %v2030_v37 = vpop.f32.mrf.mxu0 }
 0xd7b   :  { %v1055_v38 = vpop.f32.mrf.mxu1  ;;  %v1104_v39 = vpop.f32.mrf.mxu0 }
 0xd7c   :  { %v1162_v40 = vsel %vm158_vm2, %v1055_v38, -inf  ;;  %v1165_v41 = vsel %vm158_vm2, %v1104_v39, -inf }
 0xd7d   :  { %1163 = vmax.xlane.f32.xlu1 %v1162_v40  ;;  %v2035_v42 = vpop.f32.mrf.mxu1  ;;  %1166 = vmax.xlane.f32.xlu0 %v1165_v41  ;;  %v2041_v43 = vpop.f32.mrf.mxu0  ;;  %v2142_v40 = vld [vmem:[#allocation2 + $0x84] ss:$16 sps:$4 sm:$0xff]  }
 0xd7f   :  { %v1058_v44 = vpop.f32.mrf.mxu1  ;;  %v1107_v45 = vpop.f32.mrf.mxu0 }
 0xd81   :  { %v2036_v46 = vpop.f32.mrf.mxu1  ;;  %v2042_v47 = vpop.f32.mrf.mxu0 }
 0xd83   :  { %v1153_v48 = vpop.f32.mrf.mxu1 }
 0xd84   :  { %v1168_v49 = vsel %vm158_vm2, %v1153_v48, -inf }
 0xd85   :  { %v2047_v50 = vpop.f32.mrf.mxu1  ;;  %1169 = vmax.xlane.f32.xlu0 %v1168_v49 }
 0xd87   :  { %v1156_v51 = vpop.f32.mrf.mxu1 }
 0xd89   :  { %v2048_v52 = vpop.f32.mrf.mxu1 }
 0xd8e   :  { %1207 = vrot.lane.b32.xlu1 %v959_v17, %s2232_s6 }
 0xd95   :  { %v1161_v53 = vpop.xlane.xlu0 %1160 }
 0xd96   :  { %v1171_v54 = vsub.f32 %v1006_v33, %v1161_v53 }
 0xd98   :  { %v1175_v55 = vmul.f32 1.442695, %v1171_v54 }
 0xd9a   :  { %2177 = vpow2.f32 %v1175_v55 }
 0xda7   :  { %v2178_v56 = vpop.eup %2177 }
 0xda8   :  { %v1183_v57 = vsel %vm158_vm2, %v2178_v56, 0.0 }
 0xdb2   :  { %1184 = vadd.xlane.f32.xlu1 %v1183_v57 }
 0xe06   :  { %v1164_v58 = vpop.xlane.xlu1 %1163  ;;  %v1167_v59 = vpop.xlane.xlu0 %1166 }
 0xe07   :  { %v1172_v60 = vsub.f32 %v1055_v38, %v1164_v58  ;;  %v1173_v61 = vsub.f32 %v1104_v39, %v1167_v59  ;;  %v2141_v39 = vld [vmem:[#allocation2 + $0xa4] ss:$16 sps:$4 sm:$0xff]  }
 0xe09   :  { %v1177_v62 = vmul.f32 1.442695, %v1172_v60  ;;  %v1179_v63 = vmul.f32 1.442695, %v1173_v61  ;;  %v1843_v60 = vld [vmem:[%s2577_s1 + $0xd] ss:$0 sm:$0xff] }
 0xe0a   :  { %v1208_v0 = vpop.permute.xlu1 %1207 }
 0xe0b   :  { %2179 = vpow2.f32 %v1177_v62  ;;  %v1213_v1 = vsel %vm405_vm3, %v1208_v0, 0 }
 0xe0c   :  { %2181 = vpow2.f32 %v1179_v63  ;;  %2050 = vmatpush3.bf16.msra.mxu0 %v1213_v1 }
 0xe0d   :  { %2061 = vmatprep.subr.bf16.mxu0 %v2226_v8 }
 0xe0e   :  { %v1170_v2 = vpop.xlane.xlu0 %1169 }
 0xe0f   :  { %v1174_v3 = vsub.f32 %v1153_v48, %v1170_v2 }
 0xe11   :  { %v1181_v4 = vmul.f32 1.442695, %v1174_v3 }
 0xe13   :  { %2183 = vpow2.f32 %v1181_v4 }
 0xe18   :  { %v2180_v5 = vpop.eup %2179 }
 0xe19   :  { %v2182_v6 = vpop.eup %2181  ;;  %v1186_v7 = vsel %vm158_vm2, %v2180_v5, 0.0 }
 0xe1a   :  { %1187 = vadd.xlane.f32.xlu0 %v1186_v7  ;;  %v1189_v9 = vsel %vm158_vm2, %v2182_v6, 0.0 }
 0xe1b   :  { %1190 = vadd.xlane.f32.xlu1 %v1189_v9 }
 0xe20   :  { %v2184_v11 = vpop.eup %2183 }
 0xe21   :  { %v1192_v12 = vsel %vm158_vm2, %v2184_v11, 0.0 }
 0xe22   :  { %1193 = vadd.xlane.f32.xlu0 %v1192_v12  ;;  %v2144_v12 = vld [vmem:[#allocation2 + $0x88] ss:$16 sps:$4 sm:$0xff]  }
 0xe2c   :  { %1303 = vrot.lane.b32.xlu1 %v2432_v21, %s2232_s6 }
 0xe30   :  { %1351 = vrot.lane.b32.xlu1 %v2440_v25, %s2232_s6 }
 0xe38   :  { %1255 = vrot.lane.b32.xlu0 %v2434_v22, %s2232_s6 }
 0xe3b   :  { %v1185_v13 = vpop.xlane.xlu1 %1184 }
 0xe3c   :  { %2185 = vrcp.f32 %v1185_v13 }
 0xe49   :  { %v2186_v14 = vpop.eup %2185 }
 0xe4a   :  { %v1199_v15 = vmul.f32 %v2186_v14, %v2178_v56 }
 0xe4c   :  { %v1203_v16 = vpack.c.bf16 %v1199_v15, %v1199_v15 }
 0xe4e   :  { %2052 = vmatmul.mubr.msk.bf16.vlgmr.msra.gmra.mxu0 %vm158_vm2, %v1203_v16  ;;  %v1847_v16 = vld [vmem:[%s2577_s1 + $0xe] ss:$0 sm:$0xff] }
 0xe4f   :  { %2063 = vmatprep.mubr.msk.bf16.mxu0 %vm2227_vm1, %v2226_v8 }
 0xea3   :  { %v1188_v17 = vpop.xlane.xlu0 %1187 }
 0xea4   :  { %v1191_v19 = vpop.xlane.xlu1 %1190  ;;  %2187 = vrcp.f32 %v1188_v17 }
 0xea5   :  { %2189 = vrcp.f32 %v1191_v19  ;;  %v1848_v19 = vld [vmem:[%s2577_s1 + $0xf] ss:$0 sm:$0xff] }
 0xea8   :  { %v1304_v20 = vpop.permute.xlu1 %1303 }
 0xea9   :  { %v1309_v18 = vsel %vm405_vm3, %v1304_v20, 0 }
 0xeaa   :  { %2062 = vmatpush3.bf16.msra.mxu0 %v1309_v18 }
 0xeab   :  { %v1194_v21 = vpop.xlane.xlu0 %1193  ;;  %2073 = vmatprep.subr.bf16.mxu0 %v2226_v8 }
 0xeac   :  { %2191 = vrcp.f32 %v1194_v21  ;;  %v1352_v27 = vpop.permute.xlu1 %1351 }
 0xead   :  { %v1357_v31 = vsel %vm405_vm3, %v1352_v27, 0 }
 0xeaf   :  { %v1256_v22 = vpop.permute.xlu0 %1255 }
 0xeb0   :  { %v1261_v23 = vsel %vm405_vm3, %v1256_v22, 0  ;;  %v2145_v22 = vld [vmem:[#allocation2 + $0xec] ss:$16 sps:$4 sm:$0xff]  }
 0xeb1   :  { %v2188_v24 = vpop.eup %2187  ;;  %2056 = vmatpush3.bf16.msra.mxu1 %v1261_v23  ;;  %v2146_v23 = vld [vmem:[#allocation2 + $0xcc] ss:$16 sps:$4 sm:$0xff]  }
 0xeb2   :  { %v2190_v25 = vpop.eup %2189  ;;  %2067 = vmatprep.subr.bf16.mxu1 %v2226_v8  ;;  %v1200_v26 = vmul.f32 %v2188_v24, %v2180_v5  ;;  %v2147_v24 = vld [vmem:[#allocation2 + $0xac] ss:$16 sps:$4 sm:$0xff]  }
 0xeb3   :  { %v1201_v29 = vmul.f32 %v2190_v25, %v2182_v6  ;;  %v2148_v25 = vld [vmem:[#allocation2 + $0x8c] ss:$16 sps:$4 sm:$0xff]  }
 0xeb4   :  { %v1204_v30 = vpack.c.bf16 %v1200_v26, %v1200_v26  ;;  %v1849_v26 = vld [vmem:[%s2577_s1 + $0x10] ss:$0 sm:$0xff] }
 0xeb5   :  { %v1205_v28 = vpack.c.bf16 %v1201_v29, %v1201_v29 }
 0xeb6   :  { %2058 = vmatmul.mubr.msk.bf16.vlgmr.msra.gmra.mxu1 %vm158_vm2, %v1204_v30 }
 0xeb7   :  { %2064 = vmatmul.mubr.msk.bf16.vlgmr.msra.gmra.mxu0 %vm158_vm2, %v1205_v28  ;;  %2068 = vmatpush3.bf16.msra.mxu1 %v1357_v31 }
 0xeb8   :  { %2069 = vmatprep.mubr.msk.bf16.mxu1 %vm2227_vm1, %v2226_v8  ;;  %2077 = vmatprep.mubr.msk.bf16.mxu0 %vm2227_vm1, %v2226_v8 }
 0xeb9   :  { %v2192_v32 = vpop.eup %2191  ;;  %2081 = vmatprep.subr.bf16.mxu1 %v2226_v8  ;;  %2074 = vmatpush3.bf16.msra.mxu0 %v2141_v39 }
 0xeba   :  { %v1202_v33 = vmul.f32 %v2192_v32, %v2184_v11  ;;  %2075 = vmatprep.subr.bf16.mxu0 %v2226_v8  ;;  %v2143_v11 = vld [vmem:[#allocation2 + $0xa8] ss:$16 sps:$4 sm:$0xff]  }
 0xebc   :  { %v1206_v34 = vpack.c.bf16 %v1202_v33, %v1202_v33 }
 0xebd   :  { %2076 = vmatpush3.bf16.msra.mxu0 %v2142_v40 }
 0xebe   :  { %2070 = vmatmul.mubr.msk.bf16.vlgmr.msra.gmra.mxu1 %vm158_vm2, %v1206_v34  ;;  %2089 = vmatprep.subr.bf16.mxu0 %v2226_v8 }
 0xebf   :  { %2085 = vmatprep.mubr.msk.bf16.mxu1 %vm2227_vm1, %v2226_v8  ;;  %2082 = vmatpush3.bf16.msra.mxu1 %v2143_v11 }
 0xec0   :  { %2083 = vmatprep.subr.bf16.mxu1 %v2226_v8 }
 0xec3   :  { %2084 = vmatpush3.bf16.msra.mxu1 %v2144_v12 }
 0xec4   :  { %2101 = vmatprep.subr.bf16.mxu1 %v2226_v8 }
 0xf0e   :  { %v1249_v35 = vpop.f32.mrf.mxu0 }
 0xf10   :  { %v2053_v36 = vpop.f32.mrf.mxu0 }
 0xf12   :  { %v1252_v37 = vpop.f32.mrf.mxu0 }
 0xf14   :  { %v2054_v38 = vpop.f32.mrf.mxu0 }
 0xf76   :  { %v1297_v41 = vpop.f32.mrf.mxu1 }
 0xf77   :  { %v1345_v42 = vpop.f32.mrf.mxu0  ;;  %1400 = vrot.lane.b32.xlu0 %v1297_v41, %s2233_s7 }
 0xf78   :  { %1404 = vrot.lane.b32.xlu1 %v1345_v42, %s2225_s19  ;;  %v2059_v43 = vpop.f32.mrf.mxu1  ;;  %v1853_v42 = vld [vmem:[%s2577_s1 + $0x11] ss:$0 sm:$0xff] }
 0xf79   :  { %v2065_v44 = vpop.f32.mrf.mxu0 }
 0xf7a   :  { %v1300_v45 = vpop.f32.mrf.mxu1 }
 0xf7b   :  { %v1348_v46 = vpop.f32.mrf.mxu0 }
 0xf7c   :  { %v2060_v47 = vpop.f32.mrf.mxu1 }
 0xf7d   :  { %v2066_v48 = vpop.f32.mrf.mxu0 }
 0xf7e   :  { %v1393_v49 = vpop.f32.mrf.mxu1 }
 0xf7f   :  { %1408 = vrot.lane.b32.xlu0 %v1393_v49, %s2234_s8 }
 0xf80   :  { %v2071_v50 = vpop.f32.mrf.mxu1 }
 0xf82   :  { %v1396_v51 = vpop.f32.mrf.mxu1 }
 0xf84   :  { %v2072_v52 = vpop.f32.mrf.mxu1 }
 0xfe9   :  { %v1401_v53 = vpop.permute.xlu0 %1400 }
 0xfea   :  { %v1411_v54 = vsel %vm158_vm2, %v1249_v35, %v1401_v53  ;;  %v1405_v55 = vpop.permute.xlu1 %1404 }
 0xfeb   :  { %v1412_v56 = vsel %vm606_vm4, %v1411_v54, %v1405_v55  ;;  %v2149_v55 = vld [vmem:[%s2579_s3 + $0x10] ss:$8 sps:$4 sm:$0xff]  }
 0xff1   :  { %v1409_v57 = vpop.permute.xlu0 %1408 }
 0xff2   :  { %v1413_v58 = vsel %vm608_vm5, %v1412_v56, %v1409_v57  ;;  %v2150_v56 = vld [vmem:[%s2579_s3] ss:$8 sps:$4 sm:$0xff]  }
 0xff3   :  { %v1414_v59 = vpack.c.bf16 %v1413_v58, %v1413_v58 }
 0xff5   :  { %2078 = vmatmul.mubr.msk.bf16.vlgmr.msra.gmra.mxu0 %vm35_vm0, %v1414_v59 }
 0xff6   :  { %2097 = vmatprep.mubr.msk.bf16.mxu0 %vm2227_vm1, %v2226_v8  ;;  %2090 = vmatpush3.bf16.msra.mxu0 %v2145_v22 }
 0xff7   :  { %2091 = vmatprep.subr.bf16.mxu0 %v2226_v8 }
 0xffa   :  { %2092 = vmatpush3.bf16.msra.mxu0 %v2146_v23 }
 0xffb   :  { %2093 = vmatprep.subr.bf16.mxu0 %v2226_v8 }
 0xffe   :  { %2094 = vmatpush3.bf16.msra.mxu0 %v2147_v24 }
 0xfff   :  { %2095 = vmatprep.subr.bf16.mxu0 %v2226_v8 }
0x1002   :  { %2096 = vmatpush3.bf16.msra.mxu0 %v2148_v25 }
0x10b5   :  { %v1469_v61 = vpop.f32.mrf.mxu0 }
0x10b6   :  { %v1470_v62 = vadd.f32 %v1843_v60, %v1469_v61  ;;  %v1859_v61 = vld [vmem:[%s2577_s1 + $0x12] ss:$0 sm:$0xff] }
0x10b7   :  { %v2079_v63 = vpop.f32.mrf.mxu0 }
0x10b8   :  { %v1475_v0 = vadd.f32 %v1470_v62, %v2418_v10  ;;  %v1860_v63 = vld [vmem:[%s2577_s1 + $0x13] ss:$0 sm:$0xff] }
0x10b9   :  { %v1472_v1 = vpop.f32.mrf.mxu0 }
0x10ba   :  { %v1478_v2 = vsel %vm35_vm0, %v1475_v0, 0.0 }
0x10bb   :  { %1479 = vadd.xlane.f32.xlu1 %v1478_v2  ;;  %v2080_v3 = vpop.f32.mrf.mxu0 }
0x10bc   :  { %v2151_v3 = vld [vmem:[%s2579_s3 + $0x14] ss:$8 sps:$4 sm:$0xff]  }
0x1144   :  { %v1480_v4 = vpop.xlane.xlu1 %1479 }
0x1145   :  { %v1481_v5 = vmul.f32 0.03125, %v1480_v4  ;;  %v2152_v4 = vld [vmem:[%s2579_s3 + $0x4] ss:$8 sps:$4 sm:$0xff]  }
0x1147   :  { %v1482_v6 = vsub.f32 %v1475_v0, %v1481_v5  ;;  %v1679_v5 = vld [vmem:[%s2577_s1 + $0x2] sm:$0x1] }
0x1149   :  { %v1483_v7 = vmul.f32 %v1482_v6, %v1482_v6 }
0x114b   :  { %v1484_v9 = vsel %vm35_vm0, %v1483_v7, 0.0 }
0x114c   :  { %1485 = vadd.xlane.f32.xlu0 %v1484_v9 }
0x11d5   :  { %v1486_v10 = vpop.xlane.xlu0 %1485 }
0x11d6   :  { %v1487_v13 = vmul.f32 0.03125, %v1486_v10 }
0x11d8   :  { %v1488_v14 = vadd.f32 1e-12, %v1487_v13 }
0x11da   :  { %2193 = vrsqrt.f32 %v1488_v14 }
0x11e7   :  { %v2194_v15 = vpop.eup %2193 }
0x11e8   :  { %v1490_v17 = vmul.f32 %v2194_v15, %v1482_v6 }
0x11ea   :  { %v1495_v20 = vmul.f32 %v1847_v16, %v1490_v17 }
0x11ec   :  { %v1500_v18 = vadd.f32 %v1848_v19, %v1495_v20 }
0x11ee   :  { %v1501_v21 = vpack.c.bf16 %v1500_v18, %v1500_v18 }
0x11f0   :  { %2086 = vmatmul.mubr.msk.bf16.vlgmr.msra.gmra.mxu1 %vm35_vm0, %v1501_v21 }
0x11f1   :  { %2105 = vmatprep.mubr.msk.bf16.mxu1 %vm2227_vm1, %v2226_v8  ;;  %2102 = vmatpush3.bf16.msra.mxu1 %v2149_v55 }
0x11f2   :  { %2103 = vmatprep.subr.bf16.mxu1 %v2226_v8 }
0x11f5   :  { %2104 = vmatpush3.bf16.msra.mxu1 %v2150_v56 }
0x11f6   :  { %2109 = vmatprep.subr.bf16.mxu1 %v2226_v8 }
0x12b0   :  { %v1556_v27 = vpop.f32.mrf.mxu1 }
0x12b1   :  { %v1557_v29 = vadd.f32 %v1849_v26, %v1556_v27 }
0x12b2   :  { %v2087_v30 = vpop.f32.mrf.mxu1 }
0x12b3   :  { %v1563_v28 = vmul.f32 0.044715, %v1557_v29  ;;  %v1562_v38 = vmul.f32 0.5, %v1557_v29 }
0x12b4   :  { %v1559_v31 = vpop.f32.mrf.mxu1 }
0x12b5   :  { %v1564_v32 = vmul.f32 %v1563_v28, %v1557_v29 }
0x12b6   :  { %v2088_v33 = vpop.f32.mrf.mxu1 }
0x12b7   :  { %v1565_v34 = vmul.f32 %v1564_v32, %v1557_v29 }
0x12b9   :  { %v1566_v35 = vadd.f32 %v1565_v34, %v1557_v29 }
0x12bb   :  { %v1567_v36 = vmul.f32 0.7978846, %v1566_v35 }
0x12bd   :  { %2195 = vtanh.f32 %v1567_v36 }
0x12ca   :  { %v2196_v37 = vpop.eup %2195 }
0x12cb   :  { %v1569_v39 = vadd.f32 1.0, %v2196_v37 }
0x12cd   :  { %v1570_v40 = vmul.f32 %v1569_v39, %v1562_v38 }
0x12cf   :  { %v1571_v41 = vpack.c.bf16 %v1570_v40, %v1570_v40 }
0x12d1   :  { %2098 = vmatmul.mubr.msk.bf16.vlgmr.msra.gmra.mxu0 %vm797_vm6, %v1571_v41 }
0x1391   :  { %v1638_v43 = vpop.f32.mrf.mxu0 }
0x1392   :  { %v1639_v44 = vadd.f32 %v1853_v42, %v1638_v43 }
0x1393   :  { %v2099_v45 = vpop.f32.mrf.mxu0 }
0x1394   :  { %v1644_v46 = vadd.f32 %v1639_v44, %v1500_v18 }
0x1395   :  { %v1641_v47 = vpop.f32.mrf.mxu0 }
0x1396   :  { %v1647_v48 = vsel %vm35_vm0, %v1644_v46, 0.0 }
0x1397   :  { %1648 = vadd.xlane.f32.xlu0 %v1647_v48  ;;  %v2100_v49 = vpop.f32.mrf.mxu0 }
0x1420   :  { %v1649_v50 = vpop.xlane.xlu0 %1648 }
0x1421   :  { %v1650_v51 = vmul.f32 0.03125, %v1649_v50 }
0x1423   :  { %v1651_v52 = vsub.f32 %v1644_v46, %v1650_v51 }
0x1425   :  { %v1652_v53 = vmul.f32 %v1651_v52, %v1651_v52 }
0x1427   :  { %v1653_v54 = vsel %vm35_vm0, %v1652_v53, 0.0 }
0x1428   :  { %1654 = vadd.xlane.f32.xlu1 %v1653_v54 }
0x14b1   :  { %v1655_v57 = vpop.xlane.xlu1 %1654 }
0x14b2   :  { %v1656_v58 = vmul.f32 0.03125, %v1655_v57 }
0x14b4   :  { %v1657_v59 = vadd.f32 1e-12, %v1656_v58 }
0x14b6   :  { %2197 = vrsqrt.f32 %v1657_v59 }
0x14c3   :  { %v2198_v60 = vpop.eup %2197 }
0x14c4   :  { %v1659_v62 = vmul.f32 %v2198_v60, %v1651_v52 }
0x14c6   :  { %v1664_v0 = vmul.f32 %v1859_v61, %v1659_v62 }
0x14c8   :  { %v1669_v1 = vadd.f32 %v1860_v63, %v1664_v0 }
0x14ca   :  { %v1678_v2 = vpack.c.bf16 %v1669_v1, %v1669_v1 }
0x14cc   :  { %2106 = vmatmul.mubr.msk.bf16.vlgmr.msra.gmra.mxu1 %vm35_vm0, %v1678_v2 }
0x14cd   :  { %2113 = vmatprep.mubr.msk.bf16.mxu1 %vm2227_vm1, %v2226_v8  ;;  %2110 = vmatpush3.bf16.msra.mxu1 %v2151_v3 }
0x14ce   :  { %2111 = vmatprep.subr.bf16.mxu1 %v2226_v8  ;;  %v1737_v8 = vld [vmem:[%s2577_s1 + $0x3] sm:$0x1] }
0x14d1   :  { %2112 = vmatpush3.bf16.msra.mxu1 %v2152_v4 }
0x158c   :  { %v1729_v6 = vpop.f32.mrf.mxu1 }
0x158d   :  { %v1730_v7 = vadd.f32 %v1729_v6, %v1679_v5 }
0x158e   :  { %v2107_v9 = vpop.f32.mrf.mxu1 }
0x158f   :  { %2199 = vtanh.f32 %v1730_v7 }
0x1590   :  { %v1732_v11 = vpop.f32.mrf.mxu1 }
0x1592   :  { %v2108_v12 = vpop.f32.mrf.mxu1 }
0x159c   :  { %v2200_v10 = vpop.eup %2199 }
0x159d   :  { %v1736_v13 = vpack.c.bf16 %v2200_v10, %v2200_v10 }
0x159f   :  { %2114 = vmatmul.mubr.msk.bf16.vlgmr.msra.gmra.mxu1 %vm35_vm0, %v1736_v13 }
0x165f   :  { %v1787_v14 = vpop.f32.mrf.mxu1 }
0x1660   :  { %v1788_v15 = vadd.f32 %v1787_v14, %v1737_v8 }
0x1661   :  { %v2115_v16 = vpop.f32.mrf.mxu1 }
0x1662   :  { %1793 = vst [vmem:[%s2580_s4] sm:$0x1] %v1788_v15 }
0x1663   :  { %v1790_v17 = vpop.f32.mrf.mxu1 }
0x1665   :  { %v2116_v19 = vpop.f32.mrf.mxu1 }
0x1666   :  { %1798 = vsyncpa [#allocation3], 1 }

</bundles_post_ra>
